<compile_context>
chip_gen: v6e
topology: v6e:2x2x1
jax: 0.10.0
libtpu: 0.0.40
codegen_flags: <defaults>
</compile_context>

<pallas_src>
import jax
import jax.numpy as jnp
import numpy as np
from jax.experimental import pallas as pl
from jax.experimental.pallas import tpu as pltpu

OUT_PAD = 128   # fc output padded to a full lane width (lane-dense store)


def cnn_bilstm_kernel(x_ref, wband_ref, bconv_ref,
                      wih_blk_ref, bblk_ref, whh_f_ref,
                      wfc_f_ref, wfc_b_ref, bfc_ref, out_ref):
    """Single grid point, everything VMEM-resident (<2 MiB total).

    x_ref      : (B, T)                 raw input, time on lanes (Cin=1 squeezed)
    wband_ref  : (T, 2*Tp*Cout)         Conv1d(k=3,pad=1) as a banded matrix; lane
                                        j = d*(Tp*Cout) + p*Cout + o <-> conv t = 2p+d
    bconv_ref  : (1, Tp*Cout)           conv bias tiled per pooled step
    wih_blk_ref: (Tp*Cout, (Tp+1)*4H)   block-diag W_ih(fwd) per step, last block is
                                        W_ih(bwd) on the last pooled step.  Gate
                                        columns reordered to [f|i|g|o], g pre-scaled x2.
    bblk_ref   : (1, (Tp+1)*4H)         matching pre-summed biases (same reorder/scale)
    whh_f_ref  : (H, 4H)                forward W_hh (same reorder/scale)
    wfc_*_ref  : (H, OUT_PAD), bfc_ref: (1, OUT_PAD)   zero-padded past out_len
    out_ref    : (B, OUT_PAD)           lane-dense; caller slices [:, :out_len]
    """
    B, T = x_ref.shape
    H = whh_f_ref.shape[0]
    G = 4 * H
    Tp = wih_blk_ref.shape[1] // G - 1
    Cout = wih_blk_ref.shape[0] // Tp
    half = Tp * Cout

    # ---- CNN: conv (one banded matmul) -> MaxPool1d(2) (one max) -> ReLU ----
    # bias is shared by both pool taps and max/relu commute, so bias+relu once,
    # after pooling.
    x = x_ref[...]                                                        # (B, T)
    y = jnp.dot(x, wband_ref[...], preferred_element_type=jnp.float32)    # (B, 2*half)
    pooled = jnp.maximum(y[:, :half], y[:, half:])                        # (B, Tp*Cout)
    feats = jnp.maximum(pooled + bconv_ref[...], 0.0)

    # ---- all input projections in ONE MXU pass (fwd steps + bwd last step) ----
    xproj = (jnp.dot(feats, wih_blk_ref[...], preferred_element_type=jnp.float32)
             + bblk_ref[...])                                             # (B, (Tp+1)*4H)

    # ---- forward LSTM recurrence: only h @ whh + gate math per step ----
    # Gate column order (host-reordered): [f | i | g | o]; g pre-activation is
    # scaled x2 so tanh(g) == 2*sigmoid(gates_g) - 1 (one sigmoid per step total).
    whh_f = whh_f_ref[...]
    h_f = jnp.zeros((B, H), jnp.float32)
    c_f = jnp.zeros((B, H), jnp.float32)
    for t in range(Tp):        # Tp == 8: keep unrolled (switch to fori_loop if larger)
        gates = xproj[:, t * G:(t + 1) * G] + jnp.dot(
            h_f, whh_f, preferred_element_type=jnp.float32)               # (B, 4H)
        s = jax.nn.sigmoid(gates)                    # one full-vreg EUP op
        tg = 2.0 * s[:, 2 * H:3 * H] - 1.0           # == tanh(g)
        c_f = s[:, 0:H] * c_f + s[:, H:2 * H] * tg
        h_f = s[:, 3 * H:4 * H] * jnp.tanh(c_f)

    # ---- backward LSTM ----
    # The fc consumes output[:, -1, :] only; for the reversed direction that is its
    # FIRST step (zero initial state) on the last pooled feature, so one cell step
    # suffices and the h @ whh_b and f*c terms vanish exactly.  The input projection
    # for this step is the last 4H-lane block of xproj (already bias-added).
    # NOTE: this shortcut is only valid while the model uses just the last timestep
    # of the BiLSTM output (as the reference module does).
    sb = jax.nn.sigmoid(xproj[:, Tp * G:(Tp + 1) * G])                    # (B, 4H)
    c_b = sb[:, H:2 * H] * (2.0 * sb[:, 2 * H:3 * H] - 1.0)
    h_b = sb[:, 3 * H:4 * H] * jnp.tanh(c_b)

    # ---- fc(concat(h_f, h_b)) with lane-dense (padded) output, split weights ----
    out_ref[...] = (jnp.dot(h_f, wfc_f_ref[...], preferred_element_type=jnp.float32)
                    + jnp.dot(h_b, wfc_b_ref[...], preferred_element_type=jnp.float32)
                    + bfc_ref[...])


def _reorder_scale_gates(w_cols, H):
    """Columns are in PyTorch gate order [i|f|g|o]; return [f|i|2*g|o]."""
    i = w_cols[:, 0:H]
    f = w_cols[:, H:2 * H]
    g = w_cols[:, 2 * H:3 * H]
    o = w_cols[:, 3 * H:4 * H]
    return np.concatenate([f, i, 2.0 * g, o], axis=1)


def prep_params(params, T):
    """One-time parameter prep (host side): transposes, bias pre-sums, gate
    reorder + g-gate x2 scaling, conv -> banded-matmul folding, block-diagonal
    input-projection matrix, and fc lane padding — all off the per-call path."""
    (wconv, bconv, wih_f, whh_f, bih_f, bhh_f,
     wih_b, whh_b, bih_b, bhh_b, wfc, bfc) = [np.asarray(p, np.float32) for p in params]
    _ = whh_b  # unused: backward direction only needs its first (zero-state) step
    Cout = wconv.shape[0]
    H = whh_f.shape[1]
    G = 4 * H
    out_len = wfc.shape[0]
    assert T % 2 == 0, "MaxPool1d(2) path assumes even T (matches PyTorch floor)"
    Tp = T // 2

    # Conv1d(k=3, pad=1) over the raw (B, T) signal as one banded matmul.
    # Output lane j = d*(Tp*Cout) + p*Cout + o corresponds to conv step t = 2p+d,
    # so MaxPool1d(2) becomes a single max of the two lane halves.
    w3 = wconv[:, 0, :]                                   # (Cout, 3); Cin == 1
    wband = np.zeros((T, 2 * Tp * Cout), np.float32)
    for t in range(T):
        p, d = t // 2, t % 2
        j0 = d * (Tp * Cout) + p * Cout
        for k in range(3):
            src = t + k - 1                               # source index in unpadded x
            if 0 <= src < T:
                wband[src, j0:j0 + Cout] = w3[:, k]
    bconv_tiled = np.tile(bconv[None, :], (1, Tp))        # (1, Tp*Cout)

    # Gate-reordered ([f|i|g|o]) and g-scaled projection weights / biases.
    wih_f_r = _reorder_scale_gates(wih_f.T, H)            # (Cout, 4H)
    wih_b_r = _reorder_scale_gates(wih_b.T, H)            # (Cout, 4H)
    whh_f_r = _reorder_scale_gates(whh_f.T, H)            # (H, 4H)
    bf_r = _reorder_scale_gates((bih_f + bhh_f)[None, :], H)   # (1, 4H)
    bb_r = _reorder_scale_gates((bih_b + bhh_b)[None, :], H)   # (1, 4H)

    # Block-diagonal input projection: Tp forward blocks + 1 backward block that
    # multiplies only the last pooled step.
    wih_blk = np.zeros((Tp * Cout, (Tp + 1) * G), np.float32)
    b_blk = np.zeros((1, (Tp + 1) * G), np.float32)
    for p in range(Tp):
        wih_blk[p * Cout:(p + 1) * Cout, p * G:(p + 1) * G] = wih_f_r
        b_blk[:, p * G:(p + 1) * G] = bf_r
    wih_blk[(Tp - 1) * Cout:Tp * Cout, Tp * G:(Tp + 1) * G] = wih_b_r
    b_blk[:, Tp * G:(Tp + 1) * G] = bb_r

    # fc weights split per direction, lane-padded to OUT_PAD.
    wfc_t = wfc.T                                          # (2H, out_len)
    wfc_f_pad = np.zeros((H, OUT_PAD), np.float32)
    wfc_b_pad = np.zeros((H, OUT_PAD), np.float32)
    wfc_f_pad[:, :out_len] = wfc_t[0:H, :]
    wfc_b_pad[:, :out_len] = wfc_t[H:2 * H, :]
    bfc_pad = np.zeros((1, OUT_PAD), np.float32)
    bfc_pad[0, :out_len] = bfc

    prepped = tuple(jnp.asarray(a) for a in (
        wband, bconv_tiled, wih_blk, b_blk, whh_f_r,
        wfc_f_pad, wfc_b_pad, bfc_pad))
    return prepped, out_len


def make_forward(prepped, out_len, B, T):
    """Build a jitted forward(x); all parameter prep already done once."""
    n_in = 1 + len(prepped)
    call = pl.pallas_call(
        cnn_bilstm_kernel,
        out_shape=jax.ShapeDtypeStruct((B, OUT_PAD), jnp.float32),
        in_specs=[pl.BlockSpec(memory_space=pltpu.MemorySpace.VMEM)] * n_in,
        out_specs=pl.BlockSpec(memory_space=pltpu.MemorySpace.VMEM),
    )
    # TODO(synk): for larger batches (B >= 8, ideally much larger — fills the 8
    # sublanes and MXU rows), add a grid over B with
    # compiler_params=pltpu.CompilerParams(dimension_semantics=("parallel",)) so
    # the second TensorCore on v7x is used; at B=2 a grid only adds overhead.

    @jax.jit
    def forward(x):                                       # x: (B, T, 1), batch-first
        out = call(x[..., 0], *prepped)                   # squeeze Cin=1 -> time on lanes
        return out[:, :out_len, None]                     # (B, out_len, 1)

    return forward


def reference_forward(x, params):
    """Pure-JAX mirror of the PyTorch module (full bidirectional recurrence)."""
    (wconv, bconv, wih_f, whh_f, bih_f, bhh_f,
     wih_b, whh_b, bih_b, bhh_b, wfc, bfc) = params
    B, T, Cin = x.shape
    Cout = wconv.shape[0]
    H = whh_f.shape[1]

    xp = jnp.pad(x, ((0, 0), (1, 1), (0, 0)))
    y = jnp.zeros((B, T, Cout), jnp.float32)
    for k in range(3):
        y = y + jnp.einsum('btc,oc->bto', xp[:, k:k + T, :], wconv[:, :, k])
    y = jax.nn.relu(y + bconv[None, None, :])
    y = jnp.max(y.reshape(B, T // 2, 2, Cout), axis=2)        # MaxPool1d(2)

    def cell(x_t, h, c, wih, whh, bih, bhh):
        g = x_t @ wih.T + h @ whh.T + bih + bhh
        i, f, gg, o = jnp.split(g, 4, axis=1)
        c = jax.nn.sigmoid(f) * c + jax.nn.sigmoid(i) * jnp.tanh(gg)
        h = jax.nn.sigmoid(o) * jnp.tanh(c)
        return h, c

    Tp = T // 2
    h = jnp.zeros((B, H)); c = jnp.zeros((B, H))
    fwd = []
    for t in range(Tp):
        h, c = cell(y[:, t, :], h, c, wih_f, whh_f, bih_f, bhh_f)
        fwd.append(h)
    h = jnp.zeros((B, H)); c = jnp.zeros((B, H))
    bwd = [None] * Tp
    for t in range(Tp - 1, -1, -1):
        h, c = cell(y[:, t, :], h, c, wih_b, whh_b, bih_b, bhh_b)
        bwd[t] = h
    last = jnp.concatenate([fwd[-1], bwd[-1]], axis=1)        # output[:, -1, :]
    out = last @ wfc.T + bfc
    return out[:, :, None]


if __name__ == "__main__":
    key = jax.random.PRNGKey(0)
    B, T, Cin = 2, 16, 1             # batch=2, seq=16, input_size=1
    Cout, H, out_len = 32, 32, 14    # cnn_channels=32, lstm_hidden=32, output_len=14

    keys = jax.random.split(key, 13)

    def init(k, shape, scale=0.1):
        return jax.random.normal(k, shape, jnp.float32) * scale

    params = (
        init(keys[0], (Cout, Cin, 3)),      # conv weight
        init(keys[1], (Cout,)),             # conv bias
        init(keys[2], (4 * H, Cout)),       # W_ih forward
        init(keys[3], (4 * H, H)),          # W_hh forward
        init(keys[4], (4 * H,)),            # b_ih forward
        init(keys[5], (4 * H,)),            # b_hh forward
        init(keys[6], (4 * H, Cout)),       # W_ih backward
        init(keys[7], (4 * H, H)),          # W_hh backward
        init(keys[8], (4 * H,)),            # b_ih backward
        init(keys[9], (4 * H,)),            # b_hh backward
        init(keys[10], (out_len, 2 * H)),   # fc weight
        init(keys[11], (out_len,)),         # fc bias
    )
    x = jax.random.normal(keys[12], (B, T, Cin), jnp.float32)

    prepped, out_len_p = prep_params(params, T)              # one-time prep
    forward = make_forward(prepped, out_len_p, B, T)

    out = jax.block_until_ready(forward(x))
    ref = reference_forward(x, params)

    assert out.shape == (B, out_len, 1), out.shape
    np.testing.assert_allclose(np.asarray(out), np.asarray(ref), rtol=1e-4, atol=1e-4)
    print("KERNEL_OK")
</pallas_src>

<mosaic_0001>
module attributes {stable_mosaic.version = 11 : i64} {
  func.func @cnn_bilstm_kernel(%arg0: memref<2x16xf32, #tpu.memory_space<vmem>>, %arg1: memref<16x512xf32, #tpu.memory_space<vmem>>, %arg2: memref<1x256xf32, #tpu.memory_space<vmem>>, %arg3: memref<256x1152xf32, #tpu.memory_space<vmem>>, %arg4: memref<1x1152xf32, #tpu.memory_space<vmem>>, %arg5: memref<32x128xf32, #tpu.memory_space<vmem>>, %arg6: memref<32x128xf32, #tpu.memory_space<vmem>>, %arg7: memref<32x128xf32, #tpu.memory_space<vmem>>, %arg8: memref<1x128xf32, #tpu.memory_space<vmem>>, %arg9: memref<2x128xf32, #tpu.memory_space<vmem>>) attributes {dimension_semantics = [], scalar_prefetch = 0 : i64, scratch_operands = 0 : i64, tpu.core_type = #tpu.core_type<tc>} {
    %c0 = arith.constant 0 : index
    %c0_0 = arith.constant 0 : index
    %0 = vector.load %arg0[%c0, %c0_0] : memref<2x16xf32, #tpu.memory_space<vmem>>, vector<2x16xf32>
    %c0_1 = arith.constant 0 : index
    %c0_2 = arith.constant 0 : index
    %1 = vector.load %arg1[%c0_1, %c0_2] : memref<16x512xf32, #tpu.memory_space<vmem>>, vector<16x512xf32>
    %cst = arith.constant dense<0.000000e+00> : vector<2x512xf32>
    %2 = tpu.matmul %0, %1, %cst {dimension_numbers = #tpu.dot_dimension_numbers<[1], [0], [0], [1], [0, 0, 1, 1], [], []>} : vector<2x16xf32>, vector<16x512xf32>, vector<2x512xf32> -> vector<2x512xf32>
    %3 = vector.extract_strided_slice %2 {offsets = [0, 0], sizes = [2, 256], strides = [1, 1]} : vector<2x512xf32> to vector<2x256xf32>
    %4 = vector.extract_strided_slice %2 {offsets = [0, 256], sizes = [2, 256], strides = [1, 1]} : vector<2x512xf32> to vector<2x256xf32>
    %5 = arith.maximumf %3, %4 : vector<2x256xf32>
    %c0_3 = arith.constant 0 : index
    %c0_4 = arith.constant 0 : index
    %6 = vector.load %arg2[%c0_3, %c0_4] : memref<1x256xf32, #tpu.memory_space<vmem>>, vector<1x256xf32>
    %7 = vector.broadcast %6 : vector<1x256xf32> to vector<2x256xf32>
    %8 = arith.addf %5, %7 : vector<2x256xf32>
    %cst_5 = arith.constant 0.000000e+00 : f32
    %9 = vector.broadcast %cst_5 : f32 to vector<2x256xf32>
    %10 = arith.maximumf %8, %9 : vector<2x256xf32>
    %c0_6 = arith.constant 0 : index
    %c0_7 = arith.constant 0 : index
    %11 = vector.load %arg3[%c0_6, %c0_7] : memref<256x1152xf32, #tpu.memory_space<vmem>>, vector<256x1152xf32>
    %cst_8 = arith.constant dense<0.000000e+00> : vector<2x1152xf32>
    %12 = tpu.matmul %10, %11, %cst_8 {dimension_numbers = #tpu.dot_dimension_numbers<[1], [0], [0], [1], [0, 0, 1, 1], [], []>} : vector<2x256xf32>, vector<256x1152xf32>, vector<2x1152xf32> -> vector<2x1152xf32>
    %c0_9 = arith.constant 0 : index
    %c0_10 = arith.constant 0 : index
    %13 = vector.load %arg4[%c0_9, %c0_10] : memref<1x1152xf32, #tpu.memory_space<vmem>>, vector<1x1152xf32>
    %14 = vector.broadcast %13 : vector<1x1152xf32> to vector<2x1152xf32>
    %15 = arith.addf %12, %14 : vector<2x1152xf32>
    %c0_11 = arith.constant 0 : index
    %c0_12 = arith.constant 0 : index
    %16 = vector.load %arg5[%c0_11, %c0_12] : memref<32x128xf32, #tpu.memory_space<vmem>>, vector<32x128xf32>
    %cst_13 = arith.constant 0.000000e+00 : f32
    %17 = vector.broadcast %cst_13 : f32 to vector<2x32xf32>
    %cst_14 = arith.constant 0.000000e+00 : f32
    %18 = vector.broadcast %cst_14 : f32 to vector<2x32xf32>
    %19 = vector.extract_strided_slice %15 {offsets = [0, 0], sizes = [2, 128], strides = [1, 1]} : vector<2x1152xf32> to vector<2x128xf32>
    %cst_15 = arith.constant dense<0.000000e+00> : vector<2x128xf32>
    %20 = tpu.matmul %17, %16, %cst_15 {dimension_numbers = #tpu.dot_dimension_numbers<[1], [0], [0], [1], [0, 0, 1, 1], [], []>} : vector<2x32xf32>, vector<32x128xf32>, vector<2x128xf32> -> vector<2x128xf32>
    %21 = arith.addf %19, %20 : vector<2x128xf32>
    %22 = arith.negf %21 : vector<2x128xf32>
    %23 = math.exp %22 : vector<2x128xf32>
    %cst_16 = arith.constant 1.000000e+00 : f32
    %24 = vector.broadcast %cst_16 : f32 to vector<2x128xf32>
    %25 = arith.addf %24, %23 : vector<2x128xf32>
    %26 = arith.divf %24, %25 : vector<2x128xf32>
    %27 = vector.extract_strided_slice %26 {offsets = [0, 64], sizes = [2, 32], strides = [1, 1]} : vector<2x128xf32> to vector<2x32xf32>
    %cst_17 = arith.constant 2.000000e+00 : f32
    %28 = vector.broadcast %cst_17 : f32 to vector<2x32xf32>
    %29 = arith.mulf %28, %27 : vector<2x32xf32>
    %cst_18 = arith.constant 1.000000e+00 : f32
    %30 = vector.broadcast %cst_18 : f32 to vector<2x32xf32>
    %31 = arith.subf %29, %30 : vector<2x32xf32>
    %32 = vector.extract_strided_slice %26 {offsets = [0, 0], sizes = [2, 32], strides = [1, 1]} : vector<2x128xf32> to vector<2x32xf32>
    %33 = arith.mulf %32, %18 : vector<2x32xf32>
    %34 = vector.extract_strided_slice %26 {offsets = [0, 32], sizes = [2, 32], strides = [1, 1]} : vector<2x128xf32> to vector<2x32xf32>
    %35 = arith.mulf %34, %31 : vector<2x32xf32>
    %36 = arith.addf %33, %35 : vector<2x32xf32>
    %37 = vector.extract_strided_slice %26 {offsets = [0, 96], sizes = [2, 32], strides = [1, 1]} : vector<2x128xf32> to vector<2x32xf32>
    %38 = math.tanh %36 : vector<2x32xf32>
    %39 = arith.mulf %37, %38 : vector<2x32xf32>
    %40 = vector.extract_strided_slice %15 {offsets = [0, 128], sizes = [2, 128], strides = [1, 1]} : vector<2x1152xf32> to vector<2x128xf32>
    %cst_19 = arith.constant dense<0.000000e+00> : vector<2x128xf32>
    %41 = tpu.matmul %39, %16, %cst_19 {dimension_numbers = #tpu.dot_dimension_numbers<[1], [0], [0], [1], [0, 0, 1, 1], [], []>} : vector<2x32xf32>, vector<32x128xf32>, vector<2x128xf32> -> vector<2x128xf32>
    %42 = arith.addf %40, %41 : vector<2x128xf32>
    %43 = arith.negf %42 : vector<2x128xf32>
    %44 = math.exp %43 : vector<2x128xf32>
    %cst_20 = arith.constant 1.000000e+00 : f32
    %45 = vector.broadcast %cst_20 : f32 to vector<2x128xf32>
    %46 = arith.addf %45, %44 : vector<2x128xf32>
    %47 = arith.divf %45, %46 : vector<2x128xf32>
    %48 = vector.extract_strided_slice %47 {offsets = [0, 64], sizes = [2, 32], strides = [1, 1]} : vector<2x128xf32> to vector<2x32xf32>
    %cst_21 = arith.constant 2.000000e+00 : f32
    %49 = vector.broadcast %cst_21 : f32 to vector<2x32xf32>
    %50 = arith.mulf %49, %48 : vector<2x32xf32>
    %cst_22 = arith.constant 1.000000e+00 : f32
    %51 = vector.broadcast %cst_22 : f32 to vector<2x32xf32>
    %52 = arith.subf %50, %51 : vector<2x32xf32>
    %53 = vector.extract_strided_slice %47 {offsets = [0, 0], sizes = [2, 32], strides = [1, 1]} : vector<2x128xf32> to vector<2x32xf32>
    %54 = arith.mulf %53, %36 : vector<2x32xf32>
    %55 = vector.extract_strided_slice %47 {offsets = [0, 32], sizes = [2, 32], strides = [1, 1]} : vector<2x128xf32> to vector<2x32xf32>
    %56 = arith.mulf %55, %52 : vector<2x32xf32>
    %57 = arith.addf %54, %56 : vector<2x32xf32>
    %58 = vector.extract_strided_slice %47 {offsets = [0, 96], sizes = [2, 32], strides = [1, 1]} : vector<2x128xf32> to vector<2x32xf32>
    %59 = math.tanh %57 : vector<2x32xf32>
    %60 = arith.mulf %58, %59 : vector<2x32xf32>
    %61 = vector.extract_strided_slice %15 {offsets = [0, 256], sizes = [2, 128], strides = [1, 1]} : vector<2x1152xf32> to vector<2x128xf32>
    %cst_23 = arith.constant dense<0.000000e+00> : vector<2x128xf32>
    %62 = tpu.matmul %60, %16, %cst_23 {dimension_numbers = #tpu.dot_dimension_numbers<[1], [0], [0], [1], [0, 0, 1, 1], [], []>} : vector<2x32xf32>, vector<32x128xf32>, vector<2x128xf32> -> vector<2x128xf32>
    %63 = arith.addf %61, %62 : vector<2x128xf32>
    %64 = arith.negf %63 : vector<2x128xf32>
    %65 = math.exp %64 : vector<2x128xf32>
    %cst_24 = arith.constant 1.000000e+00 : f32
    %66 = vector.broadcast %cst_24 : f32 to vector<2x128xf32>
    %67 = arith.addf %66, %65 : vector<2x128xf32>
    %68 = arith.divf %66, %67 : vector<2x128xf32>
    %69 = vector.extract_strided_slice %68 {offsets = [0, 64], sizes = [2, 32], strides = [1, 1]} : vector<2x128xf32> to vector<2x32xf32>
    %cst_25 = arith.constant 2.000000e+00 : f32
    %70 = vector.broadcast %cst_25 : f32 to vector<2x32xf32>
    %71 = arith.mulf %70, %69 : vector<2x32xf32>
    %cst_26 = arith.constant 1.000000e+00 : f32
    %72 = vector.broadcast %cst_26 : f32 to vector<2x32xf32>
    %73 = arith.subf %71, %72 : vector<2x32xf32>
    %74 = vector.extract_strided_slice %68 {offsets = [0, 0], sizes = [2, 32], strides = [1, 1]} : vector<2x128xf32> to vector<2x32xf32>
    %75 = arith.mulf %74, %57 : vector<2x32xf32>
    %76 = vector.extract_strided_slice %68 {offsets = [0, 32], sizes = [2, 32], strides = [1, 1]} : vector<2x128xf32> to vector<2x32xf32>
    %77 = arith.mulf %76, %73 : vector<2x32xf32>
    %78 = arith.addf %75, %77 : vector<2x32xf32>
    %79 = vector.extract_strided_slice %68 {offsets = [0, 96], sizes = [2, 32], strides = [1, 1]} : vector<2x128xf32> to vector<2x32xf32>
    %80 = math.tanh %78 : vector<2x32xf32>
    %81 = arith.mulf %79, %80 : vector<2x32xf32>
    %82 = vector.extract_strided_slice %15 {offsets = [0, 384], sizes = [2, 128], strides = [1, 1]} : vector<2x1152xf32> to vector<2x128xf32>
    %cst_27 = arith.constant dense<0.000000e+00> : vector<2x128xf32>
    %83 = tpu.matmul %81, %16, %cst_27 {dimension_numbers = #tpu.dot_dimension_numbers<[1], [0], [0], [1], [0, 0, 1, 1], [], []>} : vector<2x32xf32>, vector<32x128xf32>, vector<2x128xf32> -> vector<2x128xf32>
    %84 = arith.addf %82, %83 : vector<2x128xf32>
    %85 = arith.negf %84 : vector<2x128xf32>
    %86 = math.exp %85 : vector<2x128xf32>
    %cst_28 = arith.constant 1.000000e+00 : f32
    %87 = vector.broadcast %cst_28 : f32 to vector<2x128xf32>
    %88 = arith.addf %87, %86 : vector<2x128xf32>
    %89 = arith.divf %87, %88 : vector<2x128xf32>
    %90 = vector.extract_strided_slice %89 {offsets = [0, 64], sizes = [2, 32], strides = [1, 1]} : vector<2x128xf32> to vector<2x32xf32>
    %cst_29 = arith.constant 2.000000e+00 : f32
    %91 = vector.broadcast %cst_29 : f32 to vector<2x32xf32>
    %92 = arith.mulf %91, %90 : vector<2x32xf32>
    %cst_30 = arith.constant 1.000000e+00 : f32
    %93 = vector.broadcast %cst_30 : f32 to vector<2x32xf32>
    %94 = arith.subf %92, %93 : vector<2x32xf32>
    %95 = vector.extract_strided_slice %89 {offsets = [0, 0], sizes = [2, 32], strides = [1, 1]} : vector<2x128xf32> to vector<2x32xf32>
    %96 = arith.mulf %95, %78 : vector<2x32xf32>
    %97 = vector.extract_strided_slice %89 {offsets = [0, 32], sizes = [2, 32], strides = [1, 1]} : vector<2x128xf32> to vector<2x32xf32>
    %98 = arith.mulf %97, %94 : vector<2x32xf32>
    %99 = arith.addf %96, %98 : vector<2x32xf32>
    %100 = vector.extract_strided_slice %89 {offsets = [0, 96], sizes = [2, 32], strides = [1, 1]} : vector<2x128xf32> to vector<2x32xf32>
    %101 = math.tanh %99 : vector<2x32xf32>
    %102 = arith.mulf %100, %101 : vector<2x32xf32>
    %103 = vector.extract_strided_slice %15 {offsets = [0, 512], sizes = [2, 128], strides = [1, 1]} : vector<2x1152xf32> to vector<2x128xf32>
    %cst_31 = arith.constant dense<0.000000e+00> : vector<2x128xf32>
    %104 = tpu.matmul %102, %16, %cst_31 {dimension_numbers = #tpu.dot_dimension_numbers<[1], [0], [0], [1], [0, 0, 1, 1], [], []>} : vector<2x32xf32>, vector<32x128xf32>, vector<2x128xf32> -> vector<2x128xf32>
    %105 = arith.addf %103, %104 : vector<2x128xf32>
    %106 = arith.negf %105 : vector<2x128xf32>
    %107 = math.exp %106 : vector<2x128xf32>
    %cst_32 = arith.constant 1.000000e+00 : f32
    %108 = vector.broadcast %cst_32 : f32 to vector<2x128xf32>
    %109 = arith.addf %108, %107 : vector<2x128xf32>
    %110 = arith.divf %108, %109 : vector<2x128xf32>
    %111 = vector.extract_strided_slice %110 {offsets = [0, 64], sizes = [2, 32], strides = [1, 1]} : vector<2x128xf32> to vector<2x32xf32>
    %cst_33 = arith.constant 2.000000e+00 : f32
    %112 = vector.broadcast %cst_33 : f32 to vector<2x32xf32>
    %113 = arith.mulf %112, %111 : vector<2x32xf32>
    %cst_34 = arith.constant 1.000000e+00 : f32
    %114 = vector.broadcast %cst_34 : f32 to vector<2x32xf32>
    %115 = arith.subf %113, %114 : vector<2x32xf32>
    %116 = vector.extract_strided_slice %110 {offsets = [0, 0], sizes = [2, 32], strides = [1, 1]} : vector<2x128xf32> to vector<2x32xf32>
    %117 = arith.mulf %116, %99 : vector<2x32xf32>
    %118 = vector.extract_strided_slice %110 {offsets = [0, 32], sizes = [2, 32], strides = [1, 1]} : vector<2x128xf32> to vector<2x32xf32>
    %119 = arith.mulf %118, %115 : vector<2x32xf32>
    %120 = arith.addf %117, %119 : vector<2x32xf32>
    %121 = vector.extract_strided_slice %110 {offsets = [0, 96], sizes = [2, 32], strides = [1, 1]} : vector<2x128xf32> to vector<2x32xf32>
    %122 = math.tanh %120 : vector<2x32xf32>
    %123 = arith.mulf %121, %122 : vector<2x32xf32>
    %124 = vector.extract_strided_slice %15 {offsets = [0, 640], sizes = [2, 128], strides = [1, 1]} : vector<2x1152xf32> to vector<2x128xf32>
    %cst_35 = arith.constant dense<0.000000e+00> : vector<2x128xf32>
    %125 = tpu.matmul %123, %16, %cst_35 {dimension_numbers = #tpu.dot_dimension_numbers<[1], [0], [0], [1], [0, 0, 1, 1], [], []>} : vector<2x32xf32>, vector<32x128xf32>, vector<2x128xf32> -> vector<2x128xf32>
    %126 = arith.addf %124, %125 : vector<2x128xf32>
    %127 = arith.negf %126 : vector<2x128xf32>
    %128 = math.exp %127 : vector<2x128xf32>
    %cst_36 = arith.constant 1.000000e+00 : f32
    %129 = vector.broadcast %cst_36 : f32 to vector<2x128xf32>
    %130 = arith.addf %129, %128 : vector<2x128xf32>
    %131 = arith.divf %129, %130 : vector<2x128xf32>
    %132 = vector.extract_strided_slice %131 {offsets = [0, 64], sizes = [2, 32], strides = [1, 1]} : vector<2x128xf32> to vector<2x32xf32>
    %cst_37 = arith.constant 2.000000e+00 : f32
    %133 = vector.broadcast %cst_37 : f32 to vector<2x32xf32>
    %134 = arith.mulf %133, %132 : vector<2x32xf32>
    %cst_38 = arith.constant 1.000000e+00 : f32
    %135 = vector.broadcast %cst_38 : f32 to vector<2x32xf32>
    %136 = arith.subf %134, %135 : vector<2x32xf32>
    %137 = vector.extract_strided_slice %131 {offsets = [0, 0], sizes = [2, 32], strides = [1, 1]} : vector<2x128xf32> to vector<2x32xf32>
    %138 = arith.mulf %137, %120 : vector<2x32xf32>
    %139 = vector.extract_strided_slice %131 {offsets = [0, 32], sizes = [2, 32], strides = [1, 1]} : vector<2x128xf32> to vector<2x32xf32>
    %140 = arith.mulf %139, %136 : vector<2x32xf32>
    %141 = arith.addf %138, %140 : vector<2x32xf32>
    %142 = vector.extract_strided_slice %131 {offsets = [0, 96], sizes = [2, 32], strides = [1, 1]} : vector<2x128xf32> to vector<2x32xf32>
    %143 = math.tanh %141 : vector<2x32xf32>
    %144 = arith.mulf %142, %143 : vector<2x32xf32>
    %145 = vector.extract_strided_slice %15 {offsets = [0, 768], sizes = [2, 128], strides = [1, 1]} : vector<2x1152xf32> to vector<2x128xf32>
    %cst_39 = arith.constant dense<0.000000e+00> : vector<2x128xf32>
    %146 = tpu.matmul %144, %16, %cst_39 {dimension_numbers = #tpu.dot_dimension_numbers<[1], [0], [0], [1], [0, 0, 1, 1], [], []>} : vector<2x32xf32>, vector<32x128xf32>, vector<2x128xf32> -> vector<2x128xf32>
    %147 = arith.addf %145, %146 : vector<2x128xf32>
    %148 = arith.negf %147 : vector<2x128xf32>
    %149 = math.exp %148 : vector<2x128xf32>
    %cst_40 = arith.constant 1.000000e+00 : f32
    %150 = vector.broadcast %cst_40 : f32 to vector<2x128xf32>
    %151 = arith.addf %150, %149 : vector<2x128xf32>
    %152 = arith.divf %150, %151 : vector<2x128xf32>
    %153 = vector.extract_strided_slice %152 {offsets = [0, 64], sizes = [2, 32], strides = [1, 1]} : vector<2x128xf32> to vector<2x32xf32>
    %cst_41 = arith.constant 2.000000e+00 : f32
    %154 = vector.broadcast %cst_41 : f32 to vector<2x32xf32>
    %155 = arith.mulf %154, %153 : vector<2x32xf32>
    %cst_42 = arith.constant 1.000000e+00 : f32
    %156 = vector.broadcast %cst_42 : f32 to vector<2x32xf32>
    %157 = arith.subf %155, %156 : vector<2x32xf32>
    %158 = vector.extract_strided_slice %152 {offsets = [0, 0], sizes = [2, 32], strides = [1, 1]} : vector<2x128xf32> to vector<2x32xf32>
    %159 = arith.mulf %158, %141 : vector<2x32xf32>
    %160 = vector.extract_strided_slice %152 {offsets = [0, 32], sizes = [2, 32], strides = [1, 1]} : vector<2x128xf32> to vector<2x32xf32>
    %161 = arith.mulf %160, %157 : vector<2x32xf32>
    %162 = arith.addf %159, %161 : vector<2x32xf32>
    %163 = vector.extract_strided_slice %152 {offsets = [0, 96], sizes = [2, 32], strides = [1, 1]} : vector<2x128xf32> to vector<2x32xf32>
    %164 = math.tanh %162 : vector<2x32xf32>
    %165 = arith.mulf %163, %164 : vector<2x32xf32>
    %166 = vector.extract_strided_slice %15 {offsets = [0, 896], sizes = [2, 128], strides = [1, 1]} : vector<2x1152xf32> to vector<2x128xf32>
    %cst_43 = arith.constant dense<0.000000e+00> : vector<2x128xf32>
    %167 = tpu.matmul %165, %16, %cst_43 {dimension_numbers = #tpu.dot_dimension_numbers<[1], [0], [0], [1], [0, 0, 1, 1], [], []>} : vector<2x32xf32>, vector<32x128xf32>, vector<2x128xf32> -> vector<2x128xf32>
    %168 = arith.addf %166, %167 : vector<2x128xf32>
    %169 = arith.negf %168 : vector<2x128xf32>
    %170 = math.exp %169 : vector<2x128xf32>
    %cst_44 = arith.constant 1.000000e+00 : f32
    %171 = vector.broadcast %cst_44 : f32 to vector<2x128xf32>
    %172 = arith.addf %171, %170 : vector<2x128xf32>
    %173 = arith.divf %171, %172 : vector<2x128xf32>
    %174 = vector.extract_strided_slice %173 {offsets = [0, 64], sizes = [2, 32], strides = [1, 1]} : vector<2x128xf32> to vector<2x32xf32>
    %cst_45 = arith.constant 2.000000e+00 : f32
    %175 = vector.broadcast %cst_45 : f32 to vector<2x32xf32>
    %176 = arith.mulf %175, %174 : vector<2x32xf32>
    %cst_46 = arith.constant 1.000000e+00 : f32
    %177 = vector.broadcast %cst_46 : f32 to vector<2x32xf32>
    %178 = arith.subf %176, %177 : vector<2x32xf32>
    %179 = vector.extract_strided_slice %173 {offsets = [0, 0], sizes = [2, 32], strides = [1, 1]} : vector<2x128xf32> to vector<2x32xf32>
    %180 = arith.mulf %179, %162 : vector<2x32xf32>
    %181 = vector.extract_strided_slice %173 {offsets = [0, 32], sizes = [2, 32], strides = [1, 1]} : vector<2x128xf32> to vector<2x32xf32>
    %182 = arith.mulf %181, %178 : vector<2x32xf32>
    %183 = arith.addf %180, %182 : vector<2x32xf32>
    %184 = vector.extract_strided_slice %173 {offsets = [0, 96], sizes = [2, 32], strides = [1, 1]} : vector<2x128xf32> to vector<2x32xf32>
    %185 = math.tanh %183 : vector<2x32xf32>
    %186 = arith.mulf %184, %185 : vector<2x32xf32>
    %187 = vector.extract_strided_slice %15 {offsets = [0, 1024], sizes = [2, 128], strides = [1, 1]} : vector<2x1152xf32> to vector<2x128xf32>
    %188 = arith.negf %187 : vector<2x128xf32>
    %189 = math.exp %188 : vector<2x128xf32>
    %cst_47 = arith.constant 1.000000e+00 : f32
    %190 = vector.broadcast %cst_47 : f32 to vector<2x128xf32>
    %191 = arith.addf %190, %189 : vector<2x128xf32>
    %192 = arith.divf %190, %191 : vector<2x128xf32>
    %193 = vector.extract_strided_slice %192 {offsets = [0, 32], sizes = [2, 32], strides = [1, 1]} : vector<2x128xf32> to vector<2x32xf32>
    %194 = vector.extract_strided_slice %192 {offsets = [0, 64], sizes = [2, 32], strides = [1, 1]} : vector<2x128xf32> to vector<2x32xf32>
    %cst_48 = arith.constant 2.000000e+00 : f32
    %195 = vector.broadcast %cst_48 : f32 to vector<2x32xf32>
    %196 = arith.mulf %195, %194 : vector<2x32xf32>
    %cst_49 = arith.constant 1.000000e+00 : f32
    %197 = vector.broadcast %cst_49 : f32 to vector<2x32xf32>
    %198 = arith.subf %196, %197 : vector<2x32xf32>
    %199 = arith.mulf %193, %198 : vector<2x32xf32>
    %200 = vector.extract_strided_slice %192 {offsets = [0, 96], sizes = [2, 32], strides = [1, 1]} : vector<2x128xf32> to vector<2x32xf32>
    %201 = math.tanh %199 : vector<2x32xf32>
    %202 = arith.mulf %200, %201 : vector<2x32xf32>
    %c0_50 = arith.constant 0 : index
    %c0_51 = arith.constant 0 : index
    %203 = vector.load %arg6[%c0_50, %c0_51] : memref<32x128xf32, #tpu.memory_space<vmem>>, vector<32x128xf32>
    %cst_52 = arith.constant dense<0.000000e+00> : vector<2x128xf32>
    %204 = tpu.matmul %186, %203, %cst_52 {dimension_numbers = #tpu.dot_dimension_numbers<[1], [0], [0], [1], [0, 0, 1, 1], [], []>} : vector<2x32xf32>, vector<32x128xf32>, vector<2x128xf32> -> vector<2x128xf32>
    %c0_53 = arith.constant 0 : index
    %c0_54 = arith.constant 0 : index
    %205 = vector.load %arg7[%c0_53, %c0_54] : memref<32x128xf32, #tpu.memory_space<vmem>>, vector<32x128xf32>
    %cst_55 = arith.constant dense<0.000000e+00> : vector<2x128xf32>
    %206 = tpu.matmul %202, %205, %cst_55 {dimension_numbers = #tpu.dot_dimension_numbers<[1], [0], [0], [1], [0, 0, 1, 1], [], []>} : vector<2x32xf32>, vector<32x128xf32>, vector<2x128xf32> -> vector<2x128xf32>
    %207 = arith.addf %204, %206 : vector<2x128xf32>
    %c0_56 = arith.constant 0 : index
    %c0_57 = arith.constant 0 : index
    %208 = vector.load %arg8[%c0_56, %c0_57] : memref<1x128xf32, #tpu.memory_space<vmem>>, vector<1x128xf32>
    %209 = vector.broadcast %208 : vector<1x128xf32> to vector<2x128xf32>
    %210 = arith.addf %207, %209 : vector<2x128xf32>
    %c0_58 = arith.constant 0 : index
    %c0_59 = arith.constant 0 : index
    %211 = vector.load %arg9[%c0_58, %c0_59] : memref<2x128xf32, #tpu.memory_space<vmem>>, vector<2x128xf32>
    tpu.vector_store %arg9[%c0_58, %c0_59], %210 {strides = array<i32>} : memref<2x128xf32, #tpu.memory_space<vmem>>, vector<2x128xf32>,
    return
  }
}

</mosaic_0001>

<bundles_post_ra>
// kernel: forward.1
= control target key start
LH: loop header
LB: loop body
LE: loop exit
PB: predicated region body
PF: predicated region fallthrough
CT: control target
= control target key end

     0   :  { %14 = vsyncpa [#allocation3], 0  ;;  %s2855_s0 = inlined_call_operand.hbm [shape: f32[2,16], index: 0, kind: input, shape index: {}]   ;;  %s2856_s1 = inlined_call_operand.hbm [shape: f32[16,512], index: 1, kind: input, shape index: {}]   ;;  %s2857_s2 = inlined_call_operand.hbm [shape: f32[1,256], index: 2, kind: input, shape index: {}]   ;;  %s2858_s3 = inlined_call_operand.hbm [shape: f32[256,1152], index: 3, kind: input, shape index: {}]   ;;  %s2859_s4 = inlined_call_operand.hbm [shape: f32[1,1152], index: 4, kind: input, shape index: {}]   ;;  %s2860_s5 = inlined_call_operand.hbm [shape: f32[32,128], index: 5, kind: input, shape index: {}]   ;;  %s2861_s6 = inlined_call_operand.hbm [shape: f32[32,128], index: 6, kind: input, shape index: {}]   ;;  %s2862_s7 = inlined_call_operand.hbm [shape: f32[32,128], index: 7, kind: input, shape index: {}]   ;;  %s2863_s8 = inlined_call_operand.hbm [shape: f32[1,128], index: 8, kind: input, shape index: {}]   ;;  %s2864_s9 = inlined_call_operand.hbm [shape: f32[2,128], index: 9, kind: output, shape index: {}]  }
   0x1   :  { %15 = vsyncpa [#allocation6], 0 }
   0x2   :  { %16 = vsyncpa [#allocation9], 0 }
   0x3   :  { %17 = vsyncpa [#allocation12], 0 }
   0x4   :  { %18 = vsyncpa [#allocation15], 0 }
   0x5   :  { %19 = vsyncpa [#allocation4], 0  ;;  %s2539_s30 = smov [#allocation5]  }
   0x6   :  { %s35_s10 = sshll.u32 %s2539_s30, 4  ;;  %s36_s10 = int_to_ptr.vmem [resolvable:$true] %s35_s10 }
   0x7   :  { %s2335_s11 = scalar_lea.vmem %s36_s10, 1024  ;;  %p2340_p1 = scmp.lt.s32.totalorder %s36_s10, %s36_s10 }
   0x8   :  { %p2336_p0 = scmp.ne.s32.totalorder %s36_s10, %s2335_s11  ;;  %p2341_p2 = scmp.lt.s32.totalorder %s2335_s11, %s2335_s11 }
   0xa   :  { %p2342_p3 = por %p2341_p2, %p2340_p1 }
   0xc   :  { %p2343_p4 = pnand %p2342_p3, %p2336_p0 }
   0xe   :  { %2346 = shalt.err (!%p2343_p4)
}
   0xf   :  { %s2540_s12 = smov 512   ;;  %s2541_s13 = smov 32  }
  0x10   :  { %41 = dma.hbm_to_vmem [thread:$0]  %s2856_s1, 1024, %s36_s10, [#allocation6], %s2540_s12, %s2540_s12, %s2541_s13  }
  0x11   :  { %s2542_s16 = smov [#allocation8]  }
  0x12   :  { %s57_s17 = sshll.u32 %s2542_s16, 4  ;;  %s58_s17 = int_to_ptr.vmem [resolvable:$true] %s57_s17 }
  0x13   :  { %s2355_s18 = scalar_lea.vmem %s58_s17, 36864  ;;  %p2360_p6 = scmp.lt.s32.totalorder %s58_s17, %s58_s17 }
  0x14   :  { %p2356_p5 = scmp.ne.s32.totalorder %s58_s17, %s2355_s18  ;;  %p2361_p7 = scmp.lt.s32.totalorder %s2355_s18, %s2355_s18 }
  0x16   :  { %p2362_p8 = por %p2361_p7, %p2360_p6 }
  0x18   :  { %p2363_p9 = pnand %p2362_p8, %p2356_p5 }
  0x1a   :  { %2366 = shalt.err (!%p2363_p9)
}
  0x1b   :  { %s2543_s19 = smov 1152   ;;  %s2544_s20 = smov 72  }
  0x1c   :  { %63 = dma.hbm_to_vmem [thread:$0]  %s2858_s3, 36864, %s58_s17, [#allocation9], %s2543_s19, %s2543_s19, %s2544_s20  }
  0x1d   :  { %s2545_s23 = smov [#allocation11]  }
  0x1e   :  { %s79_s24 = sshll.u32 %s2545_s23, 4  ;;  %s80_s24 = int_to_ptr.vmem [resolvable:$true] %s79_s24 }
  0x1f   :  { %s2375_s1 = scalar_lea.vmem %s80_s24, 512  ;;  %p2380_p11 = scmp.lt.s32.totalorder %s80_s24, %s80_s24 }
  0x20   :  { %p2376_p10 = scmp.ne.s32.totalorder %s80_s24, %s2375_s1  ;;  %p2381_p12 = scmp.lt.s32.totalorder %s2375_s1, %s2375_s1 }
  0x22   :  { %p2382_p13 = por %p2381_p12, %p2380_p11 }
  0x24   :  { %p2383_p0 = pnand %p2382_p13, %p2376_p10 }
  0x26   :  { %2386 = shalt.err (!%p2383_p0)
}
  0x27   :  { %s2546_s25 = smov 128   ;;  %s2547_s26 = smov 8  }
  0x28   :  { %85 = dma.hbm_to_vmem [thread:$0]  %s2860_s5, 512, %s80_s24, [#allocation12], %s2546_s25, %s2546_s25, %s2547_s26  }
  0x29   :  { %s2548_s3 = smov [#allocation14]   ;;  %s2549_s30 = smov [#allocation2]  }
  0x2a   :  { %s103_s29 = sshll.u32 %s2548_s3, 4  ;;  %s26_s10 = sshll.u32 %s2549_s30, 4  ;;  %s104_s29 = int_to_ptr.vmem [resolvable:$true] %s103_s29  ;;  %s27_s10 = int_to_ptr.vmem [resolvable:$true] %s26_s10 }
  0x2b   :  { %s2395_s11 = scalar_lea.vmem %s104_s29, 512  ;;  %p2400_p2 = scmp.lt.s32.totalorder %s104_s29, %s104_s29 }
  0x2c   :  { %p2396_p1 = scmp.ne.s32.totalorder %s104_s29, %s2395_s11  ;;  %p2401_p3 = scmp.lt.s32.totalorder %s2395_s11, %s2395_s11 }
  0x2e   :  { %p2402_p4 = por %p2401_p3, %p2400_p2 }
  0x30   :  { %p2403_p5 = pnand %p2402_p4, %p2396_p1 }
  0x32   :  { %2406 = shalt.err (!%p2403_p5)
}
  0x33   :  { %109 = dma.hbm_to_vmem [thread:$0]  %s2862_s7, 512, %s104_s29, [#allocation15], %s2546_s25, %s2546_s25, %s2547_s26  }
  0x34   :  { %s2415_s5 = scalar_lea.vmem %s27_s10, 32  ;;  %p2420_p7 = scmp.lt.s32.totalorder %s27_s10, %s27_s10 }
  0x35   :  { %p2416_p6 = scmp.ne.s32.totalorder %s27_s10, %s2415_s5  ;;  %p2421_p8 = scmp.lt.s32.totalorder %s2415_s5, %s2415_s5 }
  0x37   :  { %p2422_p9 = por %p2421_p8, %p2420_p7 }
  0x39   :  { %p2423_p10 = pnand %p2422_p9, %p2416_p6 }
  0x3b   :  { %2426 = shalt.err (!%p2423_p10)
}
  0x3c   :  { %29 = dma.hbm_to_vmem [thread:$0]  %s2855_s0, 32, %s27_s10, [#allocation3]  }
  0x3d   :  { %s2550_s17 = smov [#allocation7]   ;;  %s2551_s19 = smov [#allocation10]  }
  0x3e   :  { %s48_s18 = sshll.u32 %s2550_s17, 4  ;;  %s70_s20 = sshll.u32 %s2551_s19, 4  ;;  %s49_s18 = int_to_ptr.vmem [resolvable:$true] %s48_s18  ;;  %s71_s20 = int_to_ptr.vmem [resolvable:$true] %s70_s20 }
  0x3f   :  { %s2435_s21 = scalar_lea.vmem %s49_s18, 32  ;;  %p2440_p12 = scmp.lt.s32.totalorder %s49_s18, %s49_s18 }
  0x40   :  { %p2436_p11 = scmp.ne.s32.totalorder %s49_s18, %s2435_s21  ;;  %p2441_p13 = scmp.lt.s32.totalorder %s2435_s21, %s2435_s21 }
  0x42   :  { %p2442_p0 = por %p2441_p13, %p2440_p12 }
  0x44   :  { %p2443_p1 = pnand %p2442_p0, %p2436_p11 }
  0x46   :  { %2446 = shalt.err (!%p2443_p1)
}
  0x47   :  { %51 = dma.hbm_to_vmem [thread:$0]  %s2857_s2, 32, %s49_s18, [#allocation6]  }
  0x48   :  { %s2455_s23 = scalar_lea.vmem %s71_s20, 144  ;;  %s2459_s0 = scalar_lea.vmem %s71_s20, 160 }
  0x49   :  { %p2456_p2 = scmp.ne.s32.totalorder %s71_s20, %s2455_s23  ;;  %p2460_p3 = scmp.lt.s32.totalorder %s71_s20, %s71_s20 }
  0x4a   :  { %p2461_p4 = scmp.lt.s32.totalorder %s2459_s0, %s2455_s23 }
  0x4c   :  { %p2462_p5 = por %p2461_p4, %p2460_p3 }
  0x4e   :  { %p2463_p6 = pnand %p2462_p5, %p2456_p2 }
  0x50   :  { %2466 = shalt.err (!%p2463_p6)
}
  0x51   :  { %73 = dma.hbm_to_vmem [thread:$0]  %s2859_s4, 144, %s71_s20, [#allocation9]  }
  0x52   :  { %s2552_s27 = smov [#allocation13]   ;;  %s2553_s3 = smov [#allocation16]  }
  0x53   :  { %s91_s28 = sshll.u32 %s2552_s27, 4  ;;  %s116_s29 = sshll.u32 %s2553_s3, 4  ;;  %s92_s28 = int_to_ptr.vmem [resolvable:$true] %s91_s28  ;;  %s117_s29 = int_to_ptr.vmem [resolvable:$true] %s116_s29 }
  0x54   :  { %s2475_s30 = scalar_lea.vmem %s92_s28, 512  ;;  %p2480_p8 = scmp.lt.s32.totalorder %s92_s28, %s92_s28 }
  0x55   :  { %p2476_p7 = scmp.ne.s32.totalorder %s92_s28, %s2475_s30  ;;  %p2481_p9 = scmp.lt.s32.totalorder %s2475_s30, %s2475_s30 }
  0x57   :  { %p2482_p10 = por %p2481_p9, %p2480_p8 }
  0x59   :  { %p2483_p11 = pnand %p2482_p10, %p2476_p7 }
  0x5b   :  { %2486 = shalt.err (!%p2483_p11)
}
  0x5c   :  { %97 = dma.hbm_to_vmem [thread:$0]  %s2861_s6, 512, %s92_s28, [#allocation12], %s2546_s25, %s2546_s25, %s2547_s26  }
  0x5d   :  { %s2495_s4 = scalar_lea.vmem %s117_s29, 16  ;;  %s2499_s11 = scalar_lea.vmem %s117_s29, 32 }
  0x5e   :  { %p2496_p12 = scmp.ne.s32.totalorder %s117_s29, %s2495_s4  ;;  %p2500_p13 = scmp.lt.s32.totalorder %s117_s29, %s117_s29 }
  0x5f   :  { %p2501_p0 = scmp.lt.s32.totalorder %s2499_s11, %s2495_s4 }
  0x61   :  { %p2502_p1 = por %p2501_p0, %p2500_p13 }
  0x63   :  { %p2503_p2 = pnand %p2502_p1, %p2496_p12 }
  0x65   :  { %2506 = shalt.err (!%p2503_p2)
}
  0x66   :  { %119 = dma.hbm_to_vmem [thread:$0]  %s2863_s8, 16, %s117_s29, [#allocation15]  }
  0x67   :  { %2527 = dma.done.wait [#allocation3], 32  }
  0x68   :  { %2528 = vsyncadd [#allocation3], 4294967264 }
  0x69   :  { %2529 = dma.done.wait [#allocation6], 1056  }
  0x6a   :  { %2530 = vsyncadd [#allocation6], 4294966240 }
  0x6b   :  { %2531 = dma.done.wait [#allocation9], 37008  }
  0x6c   :  { %2532 = vsyncadd [#allocation9], 4294930288 }
  0x6d   :  { %2533 = dma.done.wait [#allocation12], 1024  }
  0x6e   :  { %2534 = vsyncadd [#allocation12], 4294966272 }
  0x6f   :  { %2535 = dma.done.wait [#allocation15], 528  }
  0x70   :  { %2536 = vsyncadd [#allocation15], 4294966768  ;;  %v2554_v0 = vmov 0.0   ;;  %v153_v1 = vld [vmem:[#allocation5 + $0x28] sm:$0xff]  ;;  %v155_v2 = vld [vmem:[#allocation5 + $0x38] sm:$0xff]  ;;  %vm156_vm0 = vcmask 130048  }
  0x71   :  { %224 = vmatprep.mubr.f32.mxu0 %v2554_v0  ;;  %295 = vmatprep.mubr.f32.mxu1 %v2554_v0  ;;  %v152_v3 = vld [vmem:[#allocation5 + $0x20] sm:$0xff]  ;;  %v154_v4 = vld [vmem:[#allocation5 + $0x30] sm:$0xff]  ;;  %v149_v5 = vld [vmem:[#allocation5 + $0x8] sm:$0xff]  ;;  %vm2555_vm1 = vmmov 0   ;;  %s2556_s6 = smov 96   ;;  %vm1015_vm2 = vcmask 261120  }
  0x72   :  { %188 = vmatprep.subr.mxu0 %v153_v1  ;;  %259 = vmatprep.subr.mxu1 %v155_v2  ;;  %v151_v6 = vld [vmem:[#allocation5 + $0x18] sm:$0xff]  ;;  %v148_v7 = vld [vmem:[#allocation5] sm:$0xff]  ;;  %v150_v8 = vld [vmem:[#allocation5 + $0x10] sm:$0xff]  ;;  %s2557_s8 = smov 64   ;;  %s2558_s25 = smov [#allocation17]  }
  0x73   :  { %189 = vmatpush1.msra.mxu0 %v152_v3  ;;  %260 = vmatpush1.msra.mxu1 %v154_v4  ;;  %v147_v9 = vld [vmem:[#allocation2] sm:$0x3]  ;;  %v456_v10 = vld [vmem:[#allocation8 + $0x440] sm:$0xff]  ;;  %v458_v11 = vld [vmem:[#allocation8 + $0x450] sm:$0xff]  ;;  %s2014_s26 = sshll.u32 %s2558_s25, 4  ;;  %s2015_s26 = int_to_ptr.vmem [resolvable:$true] %s2014_s26 }
  0x74   :  { %190 = vmatprep.subr.mxu0 %v149_v5  ;;  %261 = vmatprep.subr.mxu1 %v151_v6  ;;  %v455_v12 = vld [vmem:[#allocation8 + $0x438] sm:$0xff]  ;;  %v457_v13 = vld [vmem:[#allocation8 + $0x448] sm:$0xff]  ;;  %v446_v16 = vld [vmem:[#allocation8 + $0x3f0] sm:$0xff]  ;;  %s2507_s5 = scalar_lea.vmem %s2015_s26, 32  ;;  %p2512_p4 = scmp.lt.s32.totalorder %s2015_s26, %s2015_s26 }
  0x75   :  { %191 = vmatpush1.msra.mxu0 %v148_v7  ;;  %262 = vmatpush1.msra.mxu1 %v150_v8  ;;  %v447_v14 = vld [vmem:[#allocation8 + $0x3f8] sm:$0xff]  ;;  %v449_v15 = vld [vmem:[#allocation8 + $0x408] sm:$0xff]  ;;  %v448_v17 = vld [vmem:[#allocation8 + $0x400] sm:$0xff]  ;;  %p2508_p3 = scmp.ne.s32.totalorder %s2015_s26, %s2507_s5  ;;  %p2513_p5 = scmp.lt.s32.totalorder %s2507_s5, %s2507_s5 }
  0x76   :  { %2027 = vmatmul.mubr.msk.f32.vlgmr.msra.gmra.mxu0 %vm156_vm0, %v147_v9  ;;  %2028 = vmatmul.mubr.msk.f32.vlgmr.msra.gmra.mxu1 %vm156_vm0, %v147_v9  ;;  %v438_v18 = vld [vmem:[#allocation8 + $0x3b0] sm:$0xff]  ;;  %v440_v19 = vld [vmem:[#allocation8 + $0x3c0] sm:$0xff]  ;;  %v437_v20 = vld [vmem:[#allocation8 + $0x3a8] sm:$0xff] }
  0x77   :  { %657 = vmatprep.subr.mxu0 %v456_v10  ;;  %728 = vmatprep.subr.mxu1 %v458_v11  ;;  %v439_v21 = vld [vmem:[#allocation8 + $0x3b8] sm:$0xff]  ;;  %v429_v22 = vld [vmem:[#allocation8 + $0x368] sm:$0xff]  ;;  %v428_v24 = vld [vmem:[#allocation8 + $0x360] sm:$0xff]  ;;  %p2514_p6 = por %p2513_p5, %p2512_p4 }
  0x78   :  { %658 = vmatpush1.msra.mxu0 %v455_v12  ;;  %729 = vmatpush1.msra.mxu1 %v457_v13  ;;  %v431_v23 = vld [vmem:[#allocation8 + $0x378] sm:$0xff]  ;;  %v430_v25 = vld [vmem:[#allocation8 + $0x370] sm:$0xff]  ;;  %v420_v26 = vld [vmem:[#allocation8 + $0x320] sm:$0xff] }
  0x79   :  { %659 = vmatprep.subr.mxu0 %v447_v14  ;;  %730 = vmatprep.subr.mxu1 %v449_v15  ;;  %v422_v27 = vld [vmem:[#allocation8 + $0x330] sm:$0xff]  ;;  %v419_v28 = vld [vmem:[#allocation8 + $0x318] sm:$0xff]  ;;  %v421_v29 = vld [vmem:[#allocation8 + $0x328] sm:$0xff]  ;;  %p2515_p7 = pnand %p2514_p6, %p2508_p3 }
  0x7a   :  { %660 = vmatpush1.msra.mxu0 %v446_v16  ;;  %731 = vmatpush1.msra.mxu1 %v448_v17  ;;  %v411_v30 = vld [vmem:[#allocation8 + $0x2d8] sm:$0xff]  ;;  %v413_v31 = vld [vmem:[#allocation8 + $0x2e8] sm:$0xff]  ;;  %v410_v32 = vld [vmem:[#allocation8 + $0x2d0] sm:$0xff] }
  0x7b   :  { %661 = vmatprep.subr.mxu0 %v438_v18  ;;  %732 = vmatprep.subr.mxu1 %v440_v19  ;;  %v412_v33 = vld [vmem:[#allocation8 + $0x2e0] sm:$0xff]  ;;  %v402_v34 = vld [vmem:[#allocation8 + $0x290] sm:$0xff]  ;;  %v401_v36 = vld [vmem:[#allocation8 + $0x288] sm:$0xff] }
  0x7c   :  { %662 = vmatpush1.msra.mxu0 %v437_v20  ;;  %733 = vmatpush1.msra.mxu1 %v439_v21  ;;  %v404_v35 = vld [vmem:[#allocation8 + $0x2a0] sm:$0xff]  ;;  %v403_v37 = vld [vmem:[#allocation8 + $0x298] sm:$0xff]  ;;  %v393_v38 = vld [vmem:[#allocation8 + $0x248] sm:$0xff] }
  0x7d   :  { %663 = vmatprep.subr.mxu0 %v429_v22  ;;  %734 = vmatprep.subr.mxu1 %v431_v23  ;;  %v395_v39 = vld [vmem:[#allocation8 + $0x258] sm:$0xff]  ;;  %v392_v40 = vld [vmem:[#allocation8 + $0x240] sm:$0xff]  ;;  %v394_v41 = vld [vmem:[#allocation8 + $0x250] sm:$0xff] }
  0x7e   :  { %664 = vmatpush1.msra.mxu0 %v428_v24  ;;  %735 = vmatpush1.msra.mxu1 %v430_v25  ;;  %v384_v42 = vld [vmem:[#allocation8 + $0x200] sm:$0xff]  ;;  %v386_v43 = vld [vmem:[#allocation8 + $0x210] sm:$0xff]  ;;  %v383_v44 = vld [vmem:[#allocation8 + $0x1f8] sm:$0xff] }
  0x7f   :  { %665 = vmatprep.subr.mxu0 %v420_v26  ;;  %736 = vmatprep.subr.mxu1 %v422_v27  ;;  %v385_v45 = vld [vmem:[#allocation8 + $0x208] sm:$0xff]  ;;  %v375_v46 = vld [vmem:[#allocation8 + $0x1b8] sm:$0xff]  ;;  %v374_v48 = vld [vmem:[#allocation8 + $0x1b0] sm:$0xff] }
  0x80   :  { %666 = vmatpush1.msra.mxu0 %v419_v28  ;;  %737 = vmatpush1.msra.mxu1 %v421_v29  ;;  %v377_v47 = vld [vmem:[#allocation8 + $0x1c8] sm:$0xff]  ;;  %v376_v49 = vld [vmem:[#allocation8 + $0x1c0] sm:$0xff]  ;;  %v366_v50 = vld [vmem:[#allocation8 + $0x170] sm:$0xff] }
  0x81   :  { %667 = vmatprep.subr.mxu0 %v411_v30  ;;  %738 = vmatprep.subr.mxu1 %v413_v31  ;;  %v368_v51 = vld [vmem:[#allocation8 + $0x180] sm:$0xff]  ;;  %v365_v52 = vld [vmem:[#allocation8 + $0x168] sm:$0xff]  ;;  %v367_v53 = vld [vmem:[#allocation8 + $0x178] sm:$0xff] }
  0x82   :  { %668 = vmatpush1.msra.mxu0 %v410_v32  ;;  %739 = vmatpush1.msra.mxu1 %v412_v33  ;;  %v357_v54 = vld [vmem:[#allocation8 + $0x128] sm:$0xff]  ;;  %v359_v55 = vld [vmem:[#allocation8 + $0x138] sm:$0xff]  ;;  %v356_v56 = vld [vmem:[#allocation8 + $0x120] sm:$0xff] }
  0x83   :  { %669 = vmatprep.subr.mxu0 %v402_v34  ;;  %740 = vmatprep.subr.mxu1 %v404_v35  ;;  %v358_v57 = vld [vmem:[#allocation8 + $0x130] sm:$0xff]  ;;  %v348_v58 = vld [vmem:[#allocation8 + $0xe0] sm:$0xff]  ;;  %v347_v60 = vld [vmem:[#allocation8 + $0xd8] sm:$0xff] }
  0x84   :  { %670 = vmatpush1.msra.mxu0 %v401_v36  ;;  %741 = vmatpush1.msra.mxu1 %v403_v37  ;;  %v350_v59 = vld [vmem:[#allocation8 + $0xf0] sm:$0xff]  ;;  %v349_v61 = vld [vmem:[#allocation8 + $0xe8] sm:$0xff]  ;;  %v339_v62 = vld [vmem:[#allocation8 + $0x98] sm:$0xff] }
  0x85   :  { %671 = vmatprep.subr.mxu0 %v393_v38  ;;  %742 = vmatprep.subr.mxu1 %v395_v39  ;;  %v341_v63 = vld [vmem:[#allocation8 + $0xa8] sm:$0xff]  ;;  %v338_v1 = vld [vmem:[#allocation8 + $0x90] sm:$0xff]  ;;  %v340_v2 = vld [vmem:[#allocation8 + $0xa0] sm:$0xff] }
  0x86   :  { %672 = vmatpush1.msra.mxu0 %v392_v40  ;;  %743 = vmatpush1.msra.mxu1 %v394_v41  ;;  %v330_v3 = vld [vmem:[#allocation8 + $0x50] sm:$0xff]  ;;  %v332_v4 = vld [vmem:[#allocation8 + $0x60] sm:$0xff]  ;;  %v329_v5 = vld [vmem:[#allocation8 + $0x48] sm:$0xff] }
  0x87   :  { %673 = vmatprep.subr.mxu0 %v384_v42  ;;  %744 = vmatprep.subr.mxu1 %v386_v43  ;;  %v331_v6 = vld [vmem:[#allocation8 + $0x58] sm:$0xff]  ;;  %v321_v7 = vld [vmem:[#allocation8 + $0x8] sm:$0xff]  ;;  %v320_v9 = vld [vmem:[#allocation8] sm:$0xff] }
  0x88   :  { %674 = vmatpush1.msra.mxu0 %v383_v44  ;;  %745 = vmatpush1.msra.mxu1 %v385_v45  ;;  %v323_v8 = vld [vmem:[#allocation8 + $0x18] sm:$0xff]  ;;  %v322_v10 = vld [vmem:[#allocation8 + $0x10] sm:$0xff]  ;;  %v600_v11 = vld [vmem:[#allocation8 + $0x8c0] sm:$0xff] }
  0x89   :  { %675 = vmatprep.subr.mxu0 %v375_v46  ;;  %746 = vmatprep.subr.mxu1 %v377_v47  ;;  %v602_v12 = vld [vmem:[#allocation8 + $0x8d0] sm:$0xff]  ;;  %v599_v13 = vld [vmem:[#allocation8 + $0x8b8] sm:$0xff]  ;;  %v601_v14 = vld [vmem:[#allocation8 + $0x8c8] sm:$0xff] }
  0x8a   :  { %676 = vmatpush1.msra.mxu0 %v374_v48  ;;  %747 = vmatpush1.msra.mxu1 %v376_v49  ;;  %v591_v15 = vld [vmem:[#allocation8 + $0x878] sm:$0xff]  ;;  %v593_v16 = vld [vmem:[#allocation8 + $0x888] sm:$0xff]  ;;  %v590_v17 = vld [vmem:[#allocation8 + $0x870] sm:$0xff] }
  0x8b   :  { %677 = vmatprep.subr.mxu0 %v366_v50  ;;  %748 = vmatprep.subr.mxu1 %v368_v51  ;;  %v592_v18 = vld [vmem:[#allocation8 + $0x880] sm:$0xff]  ;;  %v582_v19 = vld [vmem:[#allocation8 + $0x830] sm:$0xff]  ;;  %v581_v21 = vld [vmem:[#allocation8 + $0x828] sm:$0xff] }
  0x8c   :  { %678 = vmatpush1.msra.mxu0 %v365_v52  ;;  %749 = vmatpush1.msra.mxu1 %v367_v53  ;;  %v584_v20 = vld [vmem:[#allocation8 + $0x840] sm:$0xff]  ;;  %v583_v22 = vld [vmem:[#allocation8 + $0x838] sm:$0xff]  ;;  %v573_v23 = vld [vmem:[#allocation8 + $0x7e8] sm:$0xff] }
  0x8d   :  { %679 = vmatprep.subr.mxu0 %v357_v54  ;;  %750 = vmatprep.subr.mxu1 %v359_v55  ;;  %v575_v24 = vld [vmem:[#allocation8 + $0x7f8] sm:$0xff]  ;;  %v572_v25 = vld [vmem:[#allocation8 + $0x7e0] sm:$0xff]  ;;  %v574_v26 = vld [vmem:[#allocation8 + $0x7f0] sm:$0xff] }
  0x8e   :  { %680 = vmatpush1.msra.mxu0 %v356_v56  ;;  %751 = vmatpush1.msra.mxu1 %v358_v57  ;;  %v564_v27 = vld [vmem:[#allocation8 + $0x7a0] sm:$0xff]  ;;  %v566_v28 = vld [vmem:[#allocation8 + $0x7b0] sm:$0xff]  ;;  %v563_v29 = vld [vmem:[#allocation8 + $0x798] sm:$0xff] }
  0x8f   :  { %681 = vmatprep.subr.mxu0 %v348_v58  ;;  %752 = vmatprep.subr.mxu1 %v350_v59  ;;  %v565_v30 = vld [vmem:[#allocation8 + $0x7a8] sm:$0xff]  ;;  %v555_v31 = vld [vmem:[#allocation8 + $0x758] sm:$0xff]  ;;  %v554_v33 = vld [vmem:[#allocation8 + $0x750] sm:$0xff] }
  0x90   :  { %682 = vmatpush1.msra.mxu0 %v347_v60  ;;  %753 = vmatpush1.msra.mxu1 %v349_v61  ;;  %v557_v32 = vld [vmem:[#allocation8 + $0x768] sm:$0xff]  ;;  %v556_v34 = vld [vmem:[#allocation8 + $0x760] sm:$0xff]  ;;  %v546_v35 = vld [vmem:[#allocation8 + $0x710] sm:$0xff] }
  0x91   :  { %683 = vmatprep.subr.mxu0 %v339_v62  ;;  %754 = vmatprep.subr.mxu1 %v341_v63  ;;  %v548_v36 = vld [vmem:[#allocation8 + $0x720] sm:$0xff]  ;;  %v545_v37 = vld [vmem:[#allocation8 + $0x708] sm:$0xff]  ;;  %v547_v38 = vld [vmem:[#allocation8 + $0x718] sm:$0xff] }
  0x92   :  { %684 = vmatpush1.msra.mxu0 %v338_v1  ;;  %755 = vmatpush1.msra.mxu1 %v340_v2  ;;  %v537_v39 = vld [vmem:[#allocation8 + $0x6c8] sm:$0xff]  ;;  %v539_v40 = vld [vmem:[#allocation8 + $0x6d8] sm:$0xff]  ;;  %v536_v41 = vld [vmem:[#allocation8 + $0x6c0] sm:$0xff] }
  0x93   :  { %685 = vmatprep.subr.mxu0 %v330_v3  ;;  %756 = vmatprep.subr.mxu1 %v332_v4  ;;  %v538_v42 = vld [vmem:[#allocation8 + $0x6d0] sm:$0xff]  ;;  %v528_v43 = vld [vmem:[#allocation8 + $0x680] sm:$0xff]  ;;  %v527_v45 = vld [vmem:[#allocation8 + $0x678] sm:$0xff] }
  0x94   :  { %686 = vmatpush1.msra.mxu0 %v329_v5  ;;  %757 = vmatpush1.msra.mxu1 %v331_v6  ;;  %v530_v44 = vld [vmem:[#allocation8 + $0x690] sm:$0xff]  ;;  %v529_v46 = vld [vmem:[#allocation8 + $0x688] sm:$0xff]  ;;  %v519_v47 = vld [vmem:[#allocation8 + $0x638] sm:$0xff] }
  0x95   :  { %687 = vmatprep.subr.mxu0 %v321_v7  ;;  %758 = vmatprep.subr.mxu1 %v323_v8  ;;  %v521_v48 = vld [vmem:[#allocation8 + $0x648] sm:$0xff]  ;;  %v518_v49 = vld [vmem:[#allocation8 + $0x630] sm:$0xff]  ;;  %v520_v50 = vld [vmem:[#allocation8 + $0x640] sm:$0xff] }
  0x96   :  { %688 = vmatpush1.msra.mxu0 %v320_v9  ;;  %759 = vmatpush1.msra.mxu1 %v322_v10  ;;  %v510_v51 = vld [vmem:[#allocation8 + $0x5f0] sm:$0xff]  ;;  %v512_v52 = vld [vmem:[#allocation8 + $0x600] sm:$0xff]  ;;  %v509_v53 = vld [vmem:[#allocation8 + $0x5e8] sm:$0xff] }
  0x97   :  { %689 = vmatprep.subr.mxu0 %v600_v11  ;;  %760 = vmatprep.subr.mxu1 %v602_v12  ;;  %v511_v54 = vld [vmem:[#allocation8 + $0x5f8] sm:$0xff]  ;;  %v501_v55 = vld [vmem:[#allocation8 + $0x5a8] sm:$0xff]  ;;  %v500_v57 = vld [vmem:[#allocation8 + $0x5a0] sm:$0xff] }
  0x98   :  { %690 = vmatpush2.msra.mxu0 %v599_v13  ;;  %761 = vmatpush2.msra.mxu1 %v601_v14  ;;  %v503_v56 = vld [vmem:[#allocation8 + $0x5b8] sm:$0xff]  ;;  %v502_v58 = vld [vmem:[#allocation8 + $0x5b0] sm:$0xff]  ;;  %v492_v59 = vld [vmem:[#allocation8 + $0x560] sm:$0xff]  ;;  %v306_v14 = vlaneseq }
  0x99   :  { %691 = vmatprep.subr.mxu0 %v591_v15  ;;  %762 = vmatprep.subr.mxu1 %v593_v16  ;;  %v494_v60 = vld [vmem:[#allocation8 + $0x570] sm:$0xff]  ;;  %v491_v61 = vld [vmem:[#allocation8 + $0x558] sm:$0xff]  ;;  %v493_v62 = vld [vmem:[#allocation8 + $0x568] sm:$0xff] }
  0x9a   :  { %692 = vmatpush2.msra.mxu0 %v590_v17  ;;  %763 = vmatpush2.msra.mxu1 %v592_v18  ;;  %v483_v63 = vld [vmem:[#allocation8 + $0x518] sm:$0xff]  ;;  %v485_v1 = vld [vmem:[#allocation8 + $0x528] sm:$0xff]  ;;  %v482_v2 = vld [vmem:[#allocation8 + $0x510] sm:$0xff]  ;;  %v2648_v15 = vshrl.u32 %v306_v14, 7 }
  0x9b   :  { %693 = vmatprep.subr.mxu0 %v582_v19  ;;  %764 = vmatprep.subr.mxu1 %v584_v20  ;;  %v484_v3 = vld [vmem:[#allocation8 + $0x520] sm:$0xff]  ;;  %v474_v4 = vld [vmem:[#allocation8 + $0x4d0] sm:$0xff]  ;;  %v473_v6 = vld [vmem:[#allocation8 + $0x4c8] sm:$0xff] }
  0x9c   :  { %694 = vmatpush2.msra.mxu0 %v581_v21  ;;  %765 = vmatpush2.msra.mxu1 %v583_v22  ;;  %v476_v5 = vld [vmem:[#allocation8 + $0x4e0] sm:$0xff]  ;;  %v475_v7 = vld [vmem:[#allocation8 + $0x4d8] sm:$0xff]  ;;  %v465_v8 = vld [vmem:[#allocation8 + $0x488] sm:$0xff]  ;;  %v308_v16 = vsub.s32 0, %v2648_v15  ;;  %v312_v18 = vsub.s32 1, %v2648_v15 }
  0x9d   :  { %695 = vmatprep.subr.mxu0 %v573_v23  ;;  %766 = vmatprep.subr.mxu1 %v575_v24  ;;  %v467_v9 = vld [vmem:[#allocation8 + $0x498] sm:$0xff]  ;;  %v464_v10 = vld [vmem:[#allocation8 + $0x480] sm:$0xff]  ;;  %v466_v11 = vld [vmem:[#allocation8 + $0x490] sm:$0xff] }
  0x9e   :  { %696 = vmatpush2.msra.mxu0 %v572_v25  ;;  %767 = vmatpush2.msra.mxu1 %v574_v26  ;;  %v460_v12 = vld [vmem:[#allocation8 + $0x460] sm:$0xff]  ;;  %v462_v13 = vld [vmem:[#allocation8 + $0x470] sm:$0xff]  ;;  %v304_v17 = vld [vmem:[#allocation7] sm:$0x3] }
  0x9f   :  { %697 = vmatprep.subr.mxu0 %v564_v27  ;;  %768 = vmatprep.subr.mxu1 %v566_v28  ;;  %v309_v21 = vrot.slane %v304_v17, %v308_v16  ;;  %v313_v23 = vrot.slane %v304_v17, %v312_v18  ;;  %v352_v14 = vld [vmem:[#allocation8 + $0x100] sm:$0xff]  ;;  %v354_v17 = vld [vmem:[#allocation8 + $0x110] sm:$0xff] }
  0xa0   :  { %698 = vmatpush2.msra.mxu0 %v563_v29  ;;  %769 = vmatpush2.msra.mxu1 %v565_v30 }
  0xa1   :  { %699 = vmatprep.subr.mxu0 %v555_v31  ;;  %770 = vmatprep.subr.mxu1 %v557_v32  ;;  %v459_v31 = vld [vmem:[#allocation8 + $0x458] sm:$0xff]  ;;  %v461_v32 = vld [vmem:[#allocation8 + $0x468] sm:$0xff] }
  0xa2   :  { %700 = vmatpush2.msra.mxu0 %v554_v33  ;;  %771 = vmatpush2.msra.mxu1 %v556_v34  ;;  %v451_v33 = vld [vmem:[#allocation8 + $0x418] sm:$0xff]  ;;  %v453_v34 = vld [vmem:[#allocation8 + $0x428] sm:$0xff] }
  0xa3   :  { %701 = vmatprep.subr.mxu0 %v546_v35  ;;  %772 = vmatprep.subr.mxu1 %v548_v36  ;;  %v450_v35 = vld [vmem:[#allocation8 + $0x410] sm:$0xff]  ;;  %v452_v36 = vld [vmem:[#allocation8 + $0x420] sm:$0xff] }
  0xa4   :  { %702 = vmatpush2.msra.mxu0 %v545_v37  ;;  %773 = vmatpush2.msra.mxu1 %v547_v38  ;;  %v442_v37 = vld [vmem:[#allocation8 + $0x3d0] sm:$0xff]  ;;  %v444_v38 = vld [vmem:[#allocation8 + $0x3e0] sm:$0xff] }
  0xa5   :  { %703 = vmatprep.subr.mxu0 %v537_v39  ;;  %774 = vmatprep.subr.mxu1 %v539_v40  ;;  %v441_v39 = vld [vmem:[#allocation8 + $0x3c8] sm:$0xff]  ;;  %v443_v40 = vld [vmem:[#allocation8 + $0x3d8] sm:$0xff] }
  0xa6   :  { %704 = vmatpush2.msra.mxu0 %v536_v41  ;;  %775 = vmatpush2.msra.mxu1 %v538_v42  ;;  %v433_v41 = vld [vmem:[#allocation8 + $0x388] sm:$0xff]  ;;  %v435_v42 = vld [vmem:[#allocation8 + $0x398] sm:$0xff] }
  0xa7   :  { %705 = vmatprep.subr.mxu0 %v528_v43  ;;  %776 = vmatprep.subr.mxu1 %v530_v44  ;;  %v432_v43 = vld [vmem:[#allocation8 + $0x380] sm:$0xff]  ;;  %v434_v44 = vld [vmem:[#allocation8 + $0x390] sm:$0xff] }
  0xa8   :  { %706 = vmatpush2.msra.mxu0 %v527_v45  ;;  %777 = vmatpush2.msra.mxu1 %v529_v46  ;;  %v424_v45 = vld [vmem:[#allocation8 + $0x340] sm:$0xff]  ;;  %v426_v46 = vld [vmem:[#allocation8 + $0x350] sm:$0xff] }
  0xa9   :  { %707 = vmatprep.subr.mxu0 %v519_v47  ;;  %778 = vmatprep.subr.mxu1 %v521_v48  ;;  %v423_v47 = vld [vmem:[#allocation8 + $0x338] sm:$0xff]  ;;  %v425_v48 = vld [vmem:[#allocation8 + $0x348] sm:$0xff] }
  0xaa   :  { %708 = vmatpush2.msra.mxu0 %v518_v49  ;;  %779 = vmatpush2.msra.mxu1 %v520_v50  ;;  %v415_v49 = vld [vmem:[#allocation8 + $0x2f8] sm:$0xff]  ;;  %v417_v50 = vld [vmem:[#allocation8 + $0x308] sm:$0xff] }
  0xab   :  { %709 = vmatprep.subr.mxu0 %v510_v51  ;;  %780 = vmatprep.subr.mxu1 %v512_v52  ;;  %v414_v51 = vld [vmem:[#allocation8 + $0x2f0] sm:$0xff]  ;;  %v416_v52 = vld [vmem:[#allocation8 + $0x300] sm:$0xff] }
  0xac   :  { %710 = vmatpush2.msra.mxu0 %v509_v53  ;;  %781 = vmatpush2.msra.mxu1 %v511_v54  ;;  %v406_v53 = vld [vmem:[#allocation8 + $0x2b0] sm:$0xff]  ;;  %v408_v54 = vld [vmem:[#allocation8 + $0x2c0] sm:$0xff] }
  0xad   :  { %711 = vmatprep.subr.mxu0 %v501_v55  ;;  %782 = vmatprep.subr.mxu1 %v503_v56  ;;  %v405_v55 = vld [vmem:[#allocation8 + $0x2a8] sm:$0xff]  ;;  %v407_v56 = vld [vmem:[#allocation8 + $0x2b8] sm:$0xff] }
  0xae   :  { %712 = vmatpush2.msra.mxu0 %v500_v57  ;;  %783 = vmatpush2.msra.mxu1 %v502_v58  ;;  %v397_v57 = vld [vmem:[#allocation8 + $0x268] sm:$0xff]  ;;  %v399_v58 = vld [vmem:[#allocation8 + $0x278] sm:$0xff] }
  0xaf   :  { %713 = vmatprep.subr.mxu0 %v492_v59  ;;  %784 = vmatprep.subr.mxu1 %v494_v60  ;;  %v396_v59 = vld [vmem:[#allocation8 + $0x260] sm:$0xff]  ;;  %v398_v60 = vld [vmem:[#allocation8 + $0x270] sm:$0xff] }
  0xb0   :  { %714 = vmatpush2.msra.mxu0 %v491_v61  ;;  %785 = vmatpush2.msra.mxu1 %v493_v62  ;;  %v388_v61 = vld [vmem:[#allocation8 + $0x220] sm:$0xff]  ;;  %v390_v62 = vld [vmem:[#allocation8 + $0x230] sm:$0xff] }
  0xb1   :  { %715 = vmatprep.subr.mxu0 %v483_v63  ;;  %786 = vmatprep.subr.mxu1 %v485_v1  ;;  %v387_v63 = vld [vmem:[#allocation8 + $0x218] sm:$0xff]  ;;  %v389_v1 = vld [vmem:[#allocation8 + $0x228] sm:$0xff] }
  0xb2   :  { %716 = vmatpush2.msra.mxu0 %v482_v2  ;;  %787 = vmatpush2.msra.mxu1 %v484_v3  ;;  %v379_v2 = vld [vmem:[#allocation8 + $0x1d8] sm:$0xff]  ;;  %v381_v3 = vld [vmem:[#allocation8 + $0x1e8] sm:$0xff] }
  0xb3   :  { %717 = vmatprep.subr.mxu0 %v474_v4  ;;  %788 = vmatprep.subr.mxu1 %v476_v5  ;;  %v378_v4 = vld [vmem:[#allocation8 + $0x1d0] sm:$0xff]  ;;  %v380_v5 = vld [vmem:[#allocation8 + $0x1e0] sm:$0xff] }
  0xb4   :  { %718 = vmatpush2.msra.mxu0 %v473_v6  ;;  %789 = vmatpush2.msra.mxu1 %v475_v7  ;;  %v370_v6 = vld [vmem:[#allocation8 + $0x190] sm:$0xff]  ;;  %v372_v7 = vld [vmem:[#allocation8 + $0x1a0] sm:$0xff] }
  0xb5   :  { %719 = vmatprep.subr.mxu0 %v465_v8  ;;  %790 = vmatprep.subr.mxu1 %v467_v9  ;;  %v369_v8 = vld [vmem:[#allocation8 + $0x188] sm:$0xff]  ;;  %v371_v9 = vld [vmem:[#allocation8 + $0x198] sm:$0xff] }
  0xb6   :  { %720 = vmatpush2.msra.mxu0 %v464_v10  ;;  %791 = vmatpush2.msra.mxu1 %v466_v11  ;;  %v361_v10 = vld [vmem:[#allocation8 + $0x148] sm:$0xff]  ;;  %v363_v11 = vld [vmem:[#allocation8 + $0x158] sm:$0xff] }
  0xb7   :  { %799 = vmatprep.subr.mxu0 %v460_v12  ;;  %870 = vmatprep.subr.mxu1 %v462_v13  ;;  %v360_v12 = vld [vmem:[#allocation8 + $0x140] sm:$0xff]  ;;  %v362_v13 = vld [vmem:[#allocation8 + $0x150] sm:$0xff] }
 0x136   :  { %v226_v19 = vpop.f32.mrf.mxu0  ;;  %v297_v20 = vpop.f32.mrf.mxu1 }
 0x137   :  { %v302_v22 = vmax.f32 %v226_v19, %v297_v20  ;;  %v351_v19 = vld [vmem:[#allocation8 + $0xf8] sm:$0xff]  ;;  %v353_v20 = vld [vmem:[#allocation8 + $0x108] sm:$0xff] }
 0x138   :  { %v228_v24 = vpop.f32.mrf.mxu0  ;;  %v299_v25 = vpop.f32.mrf.mxu1 }
 0x139   :  { %v303_v26 = vmax.f32 %v228_v24, %v299_v25  ;;  %v316_v27 = vadd.f32 %v309_v21, %v302_v22  ;;  %v343_v21 = vld [vmem:[#allocation8 + $0xb8] sm:$0xff]  ;;  %v345_v22 = vld [vmem:[#allocation8 + $0xc8] sm:$0xff]  ;;  %v344_v24 = vld [vmem:[#allocation8 + $0xc0] sm:$0xff] }
 0x13a   :  { %v334_v25 = vld [vmem:[#allocation8 + $0x70] sm:$0xff] }
 0x13b   :  { %v317_v28 = vadd.f32 %v313_v23, %v303_v26  ;;  %v2658_v30 = vmax.f32 %v316_v27, 0.0  ;;  %v342_v23 = vld [vmem:[#allocation8 + $0xb0] sm:$0xff]  ;;  %v336_v26 = vld [vmem:[#allocation8 + $0x80] sm:$0xff]  ;;  %v333_v27 = vld [vmem:[#allocation8 + $0x68] sm:$0xff] }
 0x13d   :  { %v2656_v29 = vmax.f32 %v317_v28, 0.0  ;;  %v335_v28 = vld [vmem:[#allocation8 + $0x78] sm:$0xff] }
 0x13f   :  { %721 = vmatprep.mubr.f32.mxu0 %v2656_v29  ;;  %792 = vmatprep.mubr.f32.mxu1 %v2656_v29 }
 0x140   :  { %722 = vmatmul.mubr.f32.vlgmr.msra.gmra.mxu0 %v2658_v30  ;;  %793 = vmatmul.mubr.f32.vlgmr.msra.gmra.mxu1 %v2658_v30 }
 0x141   :  { %800 = vmatpush1.msra.mxu0 %v459_v31  ;;  %871 = vmatpush1.msra.mxu1 %v461_v32  ;;  %v325_v31 = vld [vmem:[#allocation8 + $0x28] sm:$0xff]  ;;  %v327_v32 = vld [vmem:[#allocation8 + $0x38] sm:$0xff] }
 0x142   :  { %801 = vmatprep.subr.mxu0 %v451_v33  ;;  %863 = vmatprep.mubr.f32.mxu0 %v2656_v29  ;;  %v324_v33 = vld [vmem:[#allocation8 + $0x20] sm:$0xff] }
 0x143   :  { %872 = vmatprep.subr.mxu1 %v453_v34  ;;  %934 = vmatprep.mubr.f32.mxu1 %v2656_v29  ;;  %v326_v34 = vld [vmem:[#allocation8 + $0x30] sm:$0xff] }
 0x144   :  { %802 = vmatpush1.msra.mxu0 %v450_v35  ;;  %873 = vmatpush1.msra.mxu1 %v452_v36  ;;  %v604_v35 = vld [vmem:[#allocation8 + $0x8e0] sm:$0xff]  ;;  %v606_v36 = vld [vmem:[#allocation8 + $0x8f0] sm:$0xff] }
 0x145   :  { %803 = vmatprep.subr.mxu0 %v442_v37  ;;  %874 = vmatprep.subr.mxu1 %v444_v38  ;;  %v603_v37 = vld [vmem:[#allocation8 + $0x8d8] sm:$0xff]  ;;  %v605_v38 = vld [vmem:[#allocation8 + $0x8e8] sm:$0xff] }
 0x146   :  { %804 = vmatpush1.msra.mxu0 %v441_v39  ;;  %875 = vmatpush1.msra.mxu1 %v443_v40  ;;  %v595_v39 = vld [vmem:[#allocation8 + $0x898] sm:$0xff]  ;;  %v597_v40 = vld [vmem:[#allocation8 + $0x8a8] sm:$0xff] }
 0x147   :  { %805 = vmatprep.subr.mxu0 %v433_v41  ;;  %876 = vmatprep.subr.mxu1 %v435_v42  ;;  %v594_v41 = vld [vmem:[#allocation8 + $0x890] sm:$0xff]  ;;  %v596_v42 = vld [vmem:[#allocation8 + $0x8a0] sm:$0xff] }
 0x148   :  { %806 = vmatpush1.msra.mxu0 %v432_v43  ;;  %877 = vmatpush1.msra.mxu1 %v434_v44  ;;  %v586_v43 = vld [vmem:[#allocation8 + $0x850] sm:$0xff]  ;;  %v588_v44 = vld [vmem:[#allocation8 + $0x860] sm:$0xff] }
 0x149   :  { %807 = vmatprep.subr.mxu0 %v424_v45  ;;  %878 = vmatprep.subr.mxu1 %v426_v46  ;;  %v585_v45 = vld [vmem:[#allocation8 + $0x848] sm:$0xff]  ;;  %v587_v46 = vld [vmem:[#allocation8 + $0x858] sm:$0xff] }
 0x14a   :  { %808 = vmatpush1.msra.mxu0 %v423_v47  ;;  %879 = vmatpush1.msra.mxu1 %v425_v48  ;;  %v577_v47 = vld [vmem:[#allocation8 + $0x808] sm:$0xff]  ;;  %v579_v48 = vld [vmem:[#allocation8 + $0x818] sm:$0xff] }
 0x14b   :  { %809 = vmatprep.subr.mxu0 %v415_v49  ;;  %880 = vmatprep.subr.mxu1 %v417_v50  ;;  %v576_v49 = vld [vmem:[#allocation8 + $0x800] sm:$0xff]  ;;  %v578_v50 = vld [vmem:[#allocation8 + $0x810] sm:$0xff] }
 0x14c   :  { %810 = vmatpush1.msra.mxu0 %v414_v51  ;;  %881 = vmatpush1.msra.mxu1 %v416_v52  ;;  %v568_v51 = vld [vmem:[#allocation8 + $0x7c0] sm:$0xff]  ;;  %v570_v52 = vld [vmem:[#allocation8 + $0x7d0] sm:$0xff] }
 0x14d   :  { %811 = vmatprep.subr.mxu0 %v406_v53  ;;  %882 = vmatprep.subr.mxu1 %v408_v54  ;;  %v567_v53 = vld [vmem:[#allocation8 + $0x7b8] sm:$0xff]  ;;  %v569_v54 = vld [vmem:[#allocation8 + $0x7c8] sm:$0xff] }
 0x14e   :  { %812 = vmatpush1.msra.mxu0 %v405_v55  ;;  %883 = vmatpush1.msra.mxu1 %v407_v56  ;;  %v559_v55 = vld [vmem:[#allocation8 + $0x778] sm:$0xff]  ;;  %v561_v56 = vld [vmem:[#allocation8 + $0x788] sm:$0xff] }
 0x14f   :  { %813 = vmatprep.subr.mxu0 %v397_v57  ;;  %884 = vmatprep.subr.mxu1 %v399_v58  ;;  %v558_v57 = vld [vmem:[#allocation8 + $0x770] sm:$0xff]  ;;  %v560_v58 = vld [vmem:[#allocation8 + $0x780] sm:$0xff] }
 0x150   :  { %814 = vmatpush1.msra.mxu0 %v396_v59  ;;  %885 = vmatpush1.msra.mxu1 %v398_v60  ;;  %v550_v59 = vld [vmem:[#allocation8 + $0x730] sm:$0xff]  ;;  %v552_v60 = vld [vmem:[#allocation8 + $0x740] sm:$0xff] }
 0x151   :  { %815 = vmatprep.subr.mxu0 %v388_v61  ;;  %886 = vmatprep.subr.mxu1 %v390_v62  ;;  %v549_v61 = vld [vmem:[#allocation8 + $0x728] sm:$0xff]  ;;  %v551_v62 = vld [vmem:[#allocation8 + $0x738] sm:$0xff] }
 0x152   :  { %816 = vmatpush1.msra.mxu0 %v387_v63  ;;  %887 = vmatpush1.msra.mxu1 %v389_v1  ;;  %v541_v63 = vld [vmem:[#allocation8 + $0x6e8] sm:$0xff]  ;;  %v543_v1 = vld [vmem:[#allocation8 + $0x6f8] sm:$0xff] }
 0x153   :  { %817 = vmatprep.subr.mxu0 %v379_v2  ;;  %888 = vmatprep.subr.mxu1 %v381_v3  ;;  %v540_v2 = vld [vmem:[#allocation8 + $0x6e0] sm:$0xff]  ;;  %v542_v3 = vld [vmem:[#allocation8 + $0x6f0] sm:$0xff] }
 0x154   :  { %818 = vmatpush1.msra.mxu0 %v378_v4  ;;  %889 = vmatpush1.msra.mxu1 %v380_v5  ;;  %v532_v4 = vld [vmem:[#allocation8 + $0x6a0] sm:$0xff]  ;;  %v534_v5 = vld [vmem:[#allocation8 + $0x6b0] sm:$0xff] }
 0x155   :  { %819 = vmatprep.subr.mxu0 %v370_v6  ;;  %890 = vmatprep.subr.mxu1 %v372_v7  ;;  %v531_v6 = vld [vmem:[#allocation8 + $0x698] sm:$0xff]  ;;  %v533_v7 = vld [vmem:[#allocation8 + $0x6a8] sm:$0xff] }
 0x156   :  { %820 = vmatpush1.msra.mxu0 %v369_v8  ;;  %891 = vmatpush1.msra.mxu1 %v371_v9  ;;  %v523_v8 = vld [vmem:[#allocation8 + $0x658] sm:$0xff]  ;;  %v525_v9 = vld [vmem:[#allocation8 + $0x668] sm:$0xff] }
 0x157   :  { %821 = vmatprep.subr.mxu0 %v361_v10  ;;  %892 = vmatprep.subr.mxu1 %v363_v11  ;;  %v522_v10 = vld [vmem:[#allocation8 + $0x650] sm:$0xff]  ;;  %v524_v11 = vld [vmem:[#allocation8 + $0x660] sm:$0xff] }
 0x158   :  { %822 = vmatpush1.msra.mxu0 %v360_v12  ;;  %893 = vmatpush1.msra.mxu1 %v362_v13  ;;  %v514_v12 = vld [vmem:[#allocation8 + $0x610] sm:$0xff]  ;;  %v516_v13 = vld [vmem:[#allocation8 + $0x620] sm:$0xff] }
 0x159   :  { %823 = vmatprep.subr.mxu0 %v352_v14  ;;  %894 = vmatprep.subr.mxu1 %v354_v17  ;;  %v513_v14 = vld [vmem:[#allocation8 + $0x608] sm:$0xff]  ;;  %v515_v17 = vld [vmem:[#allocation8 + $0x618] sm:$0xff] }
 0x15a   :  { %824 = vmatpush1.msra.mxu0 %v351_v19  ;;  %895 = vmatpush1.msra.mxu1 %v353_v20  ;;  %v505_v19 = vld [vmem:[#allocation8 + $0x5c8] sm:$0xff]  ;;  %v507_v20 = vld [vmem:[#allocation8 + $0x5d8] sm:$0xff] }
 0x15b   :  { %825 = vmatprep.subr.mxu0 %v343_v21  ;;  %896 = vmatprep.subr.mxu1 %v345_v22  ;;  %v504_v21 = vld [vmem:[#allocation8 + $0x5c0] sm:$0xff]  ;;  %v506_v22 = vld [vmem:[#allocation8 + $0x5d0] sm:$0xff] }
 0x15c   :  { %826 = vmatpush1.msra.mxu0 %v342_v23  ;;  %897 = vmatpush1.msra.mxu1 %v344_v24  ;;  %v496_v23 = vld [vmem:[#allocation8 + $0x580] sm:$0xff]  ;;  %v498_v24 = vld [vmem:[#allocation8 + $0x590] sm:$0xff] }
 0x15d   :  { %827 = vmatprep.subr.mxu0 %v334_v25  ;;  %898 = vmatprep.subr.mxu1 %v336_v26  ;;  %v495_v25 = vld [vmem:[#allocation8 + $0x578] sm:$0xff]  ;;  %v497_v26 = vld [vmem:[#allocation8 + $0x588] sm:$0xff] }
 0x15e   :  { %828 = vmatpush1.msra.mxu0 %v333_v27  ;;  %899 = vmatpush1.msra.mxu1 %v335_v28  ;;  %v487_v27 = vld [vmem:[#allocation8 + $0x538] sm:$0xff]  ;;  %v489_v28 = vld [vmem:[#allocation8 + $0x548] sm:$0xff] }
 0x15f   :  { %829 = vmatprep.subr.mxu0 %v325_v31  ;;  %900 = vmatprep.subr.mxu1 %v327_v32  ;;  %v486_v31 = vld [vmem:[#allocation8 + $0x530] sm:$0xff]  ;;  %v488_v32 = vld [vmem:[#allocation8 + $0x540] sm:$0xff] }
 0x160   :  { %830 = vmatpush1.msra.mxu0 %v324_v33  ;;  %901 = vmatpush1.msra.mxu1 %v326_v34  ;;  %v478_v33 = vld [vmem:[#allocation8 + $0x4f0] sm:$0xff]  ;;  %v480_v34 = vld [vmem:[#allocation8 + $0x500] sm:$0xff] }
 0x161   :  { %831 = vmatprep.subr.mxu0 %v604_v35  ;;  %902 = vmatprep.subr.mxu1 %v606_v36  ;;  %v477_v35 = vld [vmem:[#allocation8 + $0x4e8] sm:$0xff]  ;;  %v479_v36 = vld [vmem:[#allocation8 + $0x4f8] sm:$0xff] }
 0x162   :  { %832 = vmatpush2.msra.mxu0 %v603_v37  ;;  %903 = vmatpush2.msra.mxu1 %v605_v38  ;;  %v469_v37 = vld [vmem:[#allocation8 + $0x4a8] sm:$0xff]  ;;  %v471_v38 = vld [vmem:[#allocation8 + $0x4b8] sm:$0xff] }
 0x163   :  { %833 = vmatprep.subr.mxu0 %v595_v39  ;;  %904 = vmatprep.subr.mxu1 %v597_v40  ;;  %v468_v39 = vld [vmem:[#allocation8 + $0x4a0] sm:$0xff]  ;;  %v470_v40 = vld [vmem:[#allocation8 + $0x4b0] sm:$0xff] }
 0x164   :  { %834 = vmatpush2.msra.mxu0 %v594_v41  ;;  %905 = vmatpush2.msra.mxu1 %v596_v42  ;;  %v607_v41 = vld [vmem:[#allocation8 + $0x8f8] sm:$0xff] }
 0x165   :  { %835 = vmatprep.subr.mxu0 %v586_v43  ;;  %906 = vmatprep.subr.mxu1 %v588_v44  ;;  %v463_v42 = vld [vmem:[#allocation8 + $0x478] sm:$0xff]  ;;  %v2668_v43 = vld [vmem:[#allocation11 + $0x18] sm:$0xff]  ;;  %v598_v44 = vld [vmem:[#allocation8 + $0x8b0] sm:$0xff] }
 0x166   :  { %836 = vmatpush2.msra.mxu0 %v585_v45  ;;  %907 = vmatpush2.msra.mxu1 %v587_v46  ;;  %v454_v45 = vld [vmem:[#allocation8 + $0x430] sm:$0xff]  ;;  %v2672_v46 = vld [vmem:[#allocation11 + $0x10] sm:$0xff] }
 0x167   :  { %837 = vmatprep.subr.mxu0 %v577_v47  ;;  %908 = vmatprep.subr.mxu1 %v579_v48  ;;  %v589_v47 = vld [vmem:[#allocation8 + $0x868] sm:$0xff] }
 0x168   :  { %838 = vmatpush2.msra.mxu0 %v576_v49  ;;  %909 = vmatpush2.msra.mxu1 %v578_v50  ;;  %v445_v48 = vld [vmem:[#allocation8 + $0x3e8] sm:$0xff]  ;;  %v2676_v49 = vld [vmem:[#allocation11 + $0x8] sm:$0xff]  ;;  %v580_v50 = vld [vmem:[#allocation8 + $0x820] sm:$0xff] }
 0x169   :  { %839 = vmatprep.subr.mxu0 %v568_v51  ;;  %910 = vmatprep.subr.mxu1 %v570_v52  ;;  %v436_v51 = vld [vmem:[#allocation8 + $0x3a0] sm:$0xff]  ;;  %v571_v52 = vld [vmem:[#allocation8 + $0x7d8] sm:$0xff] }
 0x16a   :  { %840 = vmatpush2.msra.mxu0 %v567_v53  ;;  %911 = vmatpush2.msra.mxu1 %v569_v54  ;;  %v427_v53 = vld [vmem:[#allocation8 + $0x358] sm:$0xff]  ;;  %v562_v54 = vld [vmem:[#allocation8 + $0x790] sm:$0xff] }
 0x16b   :  { %841 = vmatprep.subr.mxu0 %v559_v55  ;;  %912 = vmatprep.subr.mxu1 %v561_v56  ;;  %v418_v55 = vld [vmem:[#allocation8 + $0x310] sm:$0xff]  ;;  %v553_v56 = vld [vmem:[#allocation8 + $0x748] sm:$0xff] }
 0x16c   :  { %842 = vmatpush2.msra.mxu0 %v558_v57  ;;  %913 = vmatpush2.msra.mxu1 %v560_v58  ;;  %v409_v57 = vld [vmem:[#allocation8 + $0x2c8] sm:$0xff]  ;;  %v544_v58 = vld [vmem:[#allocation8 + $0x700] sm:$0xff] }
 0x16d   :  { %843 = vmatprep.subr.mxu0 %v550_v59  ;;  %914 = vmatprep.subr.mxu1 %v552_v60  ;;  %v400_v59 = vld [vmem:[#allocation8 + $0x280] sm:$0xff]  ;;  %v535_v60 = vld [vmem:[#allocation8 + $0x6b8] sm:$0xff] }
 0x16e   :  { %844 = vmatpush2.msra.mxu0 %v549_v61  ;;  %915 = vmatpush2.msra.mxu1 %v551_v62  ;;  %v391_v61 = vld [vmem:[#allocation8 + $0x238] sm:$0xff]  ;;  %v526_v62 = vld [vmem:[#allocation8 + $0x670] sm:$0xff] }
 0x16f   :  { %845 = vmatprep.subr.mxu0 %v541_v63  ;;  %916 = vmatprep.subr.mxu1 %v543_v1  ;;  %v382_v63 = vld [vmem:[#allocation8 + $0x1f0] sm:$0xff]  ;;  %v517_v1 = vld [vmem:[#allocation8 + $0x628] sm:$0xff] }
 0x170   :  { %846 = vmatpush2.msra.mxu0 %v540_v2  ;;  %917 = vmatpush2.msra.mxu1 %v542_v3  ;;  %v373_v2 = vld [vmem:[#allocation8 + $0x1a8] sm:$0xff]  ;;  %v508_v3 = vld [vmem:[#allocation8 + $0x5e0] sm:$0xff] }
 0x171   :  { %847 = vmatprep.subr.mxu0 %v532_v4  ;;  %918 = vmatprep.subr.mxu1 %v534_v5  ;;  %v364_v4 = vld [vmem:[#allocation8 + $0x160] sm:$0xff]  ;;  %v499_v5 = vld [vmem:[#allocation8 + $0x598] sm:$0xff] }
 0x172   :  { %848 = vmatpush2.msra.mxu0 %v531_v6  ;;  %919 = vmatpush2.msra.mxu1 %v533_v7  ;;  %v355_v6 = vld [vmem:[#allocation8 + $0x118] sm:$0xff]  ;;  %v490_v7 = vld [vmem:[#allocation8 + $0x550] sm:$0xff] }
 0x173   :  { %849 = vmatprep.subr.mxu0 %v523_v8  ;;  %920 = vmatprep.subr.mxu1 %v525_v9  ;;  %v346_v8 = vld [vmem:[#allocation8 + $0xd0] sm:$0xff]  ;;  %v481_v9 = vld [vmem:[#allocation8 + $0x508] sm:$0xff] }
 0x174   :  { %850 = vmatpush2.msra.mxu0 %v522_v10  ;;  %921 = vmatpush2.msra.mxu1 %v524_v11  ;;  %v337_v10 = vld [vmem:[#allocation8 + $0x88] sm:$0xff]  ;;  %v472_v11 = vld [vmem:[#allocation8 + $0x4c0] sm:$0xff] }
 0x175   :  { %851 = vmatprep.subr.mxu0 %v514_v12  ;;  %922 = vmatprep.subr.mxu1 %v516_v13  ;;  %v328_v12 = vld [vmem:[#allocation8 + $0x40] sm:$0xff] }
 0x176   :  { %852 = vmatpush2.msra.mxu0 %v513_v14  ;;  %923 = vmatpush2.msra.mxu1 %v515_v17  ;;  %v2713_v13 = vld [vmem:[#allocation10] sm:$0xff] }
 0x177   :  { %853 = vmatprep.subr.mxu0 %v505_v19  ;;  %924 = vmatprep.subr.mxu1 %v507_v20  ;;  %v615_v19 = vrot.slane %v2713_v13, %v308_v16 }
 0x178   :  { %854 = vmatpush2.msra.mxu0 %v504_v21  ;;  %925 = vmatpush2.msra.mxu1 %v506_v22 }
 0x179   :  { %855 = vmatprep.subr.mxu0 %v496_v23  ;;  %926 = vmatprep.subr.mxu1 %v498_v24 }
 0x17a   :  { %856 = vmatpush2.msra.mxu0 %v495_v25  ;;  %927 = vmatpush2.msra.mxu1 %v497_v26 }
 0x17b   :  { %857 = vmatprep.subr.mxu0 %v487_v27  ;;  %928 = vmatprep.subr.mxu1 %v489_v28 }
 0x17c   :  { %858 = vmatpush2.msra.mxu0 %v486_v31  ;;  %929 = vmatpush2.msra.mxu1 %v488_v32 }
 0x17d   :  { %859 = vmatprep.subr.mxu0 %v478_v33  ;;  %930 = vmatprep.subr.mxu1 %v480_v34 }
 0x17e   :  { %860 = vmatpush2.msra.mxu0 %v477_v35  ;;  %931 = vmatpush2.msra.mxu1 %v479_v36 }
 0x17f   :  { %861 = vmatprep.subr.mxu0 %v469_v37  ;;  %932 = vmatprep.subr.mxu1 %v471_v38 }
 0x180   :  { %862 = vmatpush2.msra.mxu0 %v468_v39  ;;  %933 = vmatpush2.msra.mxu1 %v470_v40 }
 0x181   :  { %864 = vmatmul.mubr.f32.vlgmr.msra.gmra.mxu0 %v2658_v30  ;;  %935 = vmatmul.mubr.f32.vlgmr.msra.gmra.mxu1 %v2658_v30 }
 0x182   :  { %2058 = vmatprep.subr.mxu0 %v607_v41  ;;  %2143 = vmatprep.subr.mxu1 %v2554_v0 }
 0x183   :  { %2059 = vmatpush3.msra.mxu0 %v463_v42  ;;  %1005 = vmatprep.mubr.f32.mxu0 %v2656_v29  ;;  %v2680_v29 = vld [vmem:[#allocation11] sm:$0xff]  ;;  %v619_v42 = vrot.slane %v2713_v13, %v312_v18 }
 0x184   :  { %2144 = vmatpush3.msra.mxu1 %v2668_v43  ;;  %2060 = vmatprep.subr.mxu0 %v598_v44 }
 0x185   :  { %2145 = vmatprep.subr.mxu1 %v2554_v0  ;;  %2061 = vmatpush3.msra.mxu0 %v454_v45 }
 0x186   :  { %2146 = vmatpush3.msra.mxu1 %v2672_v46  ;;  %2062 = vmatprep.subr.mxu0 %v589_v47 }
 0x187   :  { %2147 = vmatprep.subr.mxu1 %v2554_v0  ;;  %2063 = vmatpush3.msra.mxu0 %v445_v48 }
 0x188   :  { %2148 = vmatpush3.msra.mxu1 %v2676_v49  ;;  %2064 = vmatprep.subr.mxu0 %v580_v50 }
 0x189   :  { %2149 = vmatprep.subr.mxu1 %v2554_v0  ;;  %2065 = vmatpush3.msra.mxu0 %v436_v51 }
 0x18a   :  { %2150 = vmatpush3.msra.mxu1 %v2680_v29  ;;  %2151 = vmatprep.mubr.msk.f32.mxu1 %vm2555_vm1, %v2554_v0 }
 0x18b   :  { %2066 = vmatprep.subr.mxu0 %v571_v52  ;;  %2152 = vmatmul.mubr.f32.vlgmr.msra.gmra.mxu1 %v2554_v0 }
 0x18c   :  { %2067 = vmatpush3.msra.mxu0 %v427_v53  ;;  %2154 = vmatprep.subr.mxu1 %v2554_v0 }
 0x18d   :  { %2068 = vmatprep.subr.mxu0 %v562_v54  ;;  %2155 = vmatpush3.msra.mxu1 %v2668_v43 }
 0x18e   :  { %2069 = vmatpush3.msra.mxu0 %v418_v55  ;;  %2156 = vmatprep.subr.mxu1 %v2554_v0 }
 0x18f   :  { %2070 = vmatprep.subr.mxu0 %v553_v56  ;;  %2157 = vmatpush3.msra.mxu1 %v2672_v46 }
 0x190   :  { %2071 = vmatpush3.msra.mxu0 %v409_v57  ;;  %2158 = vmatprep.subr.mxu1 %v2554_v0 }
 0x191   :  { %2072 = vmatprep.subr.mxu0 %v544_v58  ;;  %2159 = vmatpush3.msra.mxu1 %v2676_v49 }
 0x192   :  { %2073 = vmatpush3.msra.mxu0 %v400_v59  ;;  %2160 = vmatprep.subr.mxu1 %v2554_v0 }
 0x193   :  { %2074 = vmatprep.subr.mxu0 %v535_v60  ;;  %2161 = vmatpush3.msra.mxu1 %v2680_v29 }
 0x194   :  { %2075 = vmatpush3.msra.mxu0 %v391_v61  ;;  %2162 = vmatprep.mubr.msk.f32.mxu1 %vm2555_vm1, %v2554_v0 }
 0x195   :  { %2076 = vmatprep.subr.mxu0 %v526_v62  ;;  %2165 = vmatprep.subr.mxu1 %v2554_v0 }
 0x196   :  { %2077 = vmatpush3.msra.mxu0 %v382_v63 }
 0x197   :  { %2078 = vmatprep.subr.mxu0 %v517_v1 }
 0x198   :  { %2079 = vmatpush3.msra.mxu0 %v373_v2  ;;  %v622_v2 = vsub.s32 2, %v2648_v15 }
 0x199   :  { %2080 = vmatprep.subr.mxu0 %v508_v3 }
 0x19a   :  { %2081 = vmatpush3.msra.mxu0 %v364_v4  ;;  %v623_v3 = vrot.slane %v2713_v13, %v622_v2 }
 0x19b   :  { %2082 = vmatprep.subr.mxu0 %v499_v5 }
 0x19c   :  { %2083 = vmatpush3.msra.mxu0 %v355_v6 }
 0x19d   :  { %2084 = vmatprep.subr.mxu0 %v490_v7 }
 0x19e   :  { %2085 = vmatpush3.msra.mxu0 %v346_v8 }
 0x19f   :  { %2086 = vmatprep.subr.mxu0 %v481_v9 }
 0x1a0   :  { %2087 = vmatpush3.msra.mxu0 %v337_v10 }
 0x1a1   :  { %2088 = vmatprep.subr.mxu0 %v472_v11 }
 0x1a2   :  { %2089 = vmatpush3.msra.mxu0 %v328_v12 }
 0x1a3   :  { %1006 = vmatmul.mubr.f32.vlgmr.msra.gmra.mxu0 %v2658_v30  ;;  %2187 = vmatprep.subr.mxu0 %v2554_v0 }
 0x1a4   :  { %2188 = vmatpush3.msra.mxu0 %v2668_v43  ;;  %2195 = vmatprep.mubr.msk.f32.mxu0 %vm2555_vm1, %v2554_v0 }
 0x1a5   :  { %2189 = vmatprep.subr.mxu0 %v2554_v0 }
 0x1a6   :  { %2190 = vmatpush3.msra.mxu0 %v2672_v46 }
 0x1a7   :  { %2191 = vmatprep.subr.mxu0 %v2554_v0 }
 0x1a8   :  { %2192 = vmatpush3.msra.mxu0 %v2676_v49 }
 0x1a9   :  { %2193 = vmatprep.subr.mxu0 %v2554_v0 }
 0x1aa   :  { %2194 = vmatpush3.msra.mxu0 %v2680_v29 }
 0x1ab   :  { %2209 = vmatprep.subr.mxu0 %v2554_v0 }
 0x200   :  { %v2711_v30 = vpop.f32.mrf.mxu1  ;;  %v723_v20 = vpop.f32.mrf.mxu0 }
 0x201   :  { %v724_v22 = vadd.f32 %v723_v20, %v615_v19  ;;  %v795_v4 = vadd.f32 %v2711_v30, %v623_v3 }
 0x202   :  { %v2715_v14 = vpop.f32.mrf.mxu1  ;;  %v725_v44 = vpop.f32.mrf.mxu0 }
 0x203   :  { %v726_v45 = vadd.f32 %v725_v44, %v619_v42 }
 0x241   :  { %v2717_v17 = vpop.f32.mrf.mxu1 }
 0x243   :  { %v2722_v21 = vpop.f32.mrf.mxu1 }
 0x24b   :  { %v1085_v23 = vpop.f32.mrf.mxu1 }
 0x24c   :  { %v1089_v24 = vadd.f32 %v1085_v23, %v724_v22 }
 0x24d   :  { %v2153_v25 = vpop.f32.mrf.mxu1 }
 0x24e   :  { %v2030_v26 = vmul.f32 -1.442695, %v1089_v24 }
 0x250   :  { %2273 = vpow2.f32 %v2030_v26 }
 0x25d   :  { %v2274_v27 = vpop.eup %2273 }
 0x25e   :  { %v1093_v28 = vadd.f32 1.0, %v2274_v27 }
 0x260   :  { %2275 = vrcp.f32 %v1093_v28 }
 0x26d   :  { %v2276_v31 = vpop.eup %2275 }
 0x26e   :  { %v1096_v32 = vmul.f32 2.0, %v2276_v31  ;;  %v1098_v35 = vmul.f32 0.0, %v2276_v31 }
 0x270   :  { %v2031_v33 = vadd.f32 -1.0, %v1096_v32 }
 0x272   :  { %1100 = vrot.lane.b32.xlu0 %v2031_v33, %s2556_s6 }
 0x2e4   :  { %v1101_v34 = vpop.permute.xlu0 %1100 }
 0x2e5   :  { %v1103_v16 = vmul.f32 %v2276_v31, %v1101_v34 }
 0x2e7   :  { %1105 = vrot.lane.b32.xlu0 %v1103_v16, %s2556_s6 }
 0x359   :  { %v1106_v36 = vpop.permute.xlu0 %1105 }
 0x35a   :  { %v1108_v37 = vadd.f32 %v1106_v36, %v1098_v35 }
 0x35c   :  { %2277 = vtanh.f32 %v1108_v37 }
 0x369   :  { %v2278_v38 = vpop.eup %2277 }
 0x36a   :  { %1111 = vrot.lane.b32.xlu1 %v2278_v38, %s2556_s6 }
 0x3dc   :  { %v1112_v39 = vpop.permute.xlu1 %1111 }
 0x3dd   :  { %v1114_v40 = vmul.f32 %v2276_v31, %v1112_v39  ;;  %v626_v31 = vsub.s32 3, %v2648_v15 }
 0x3df   :  { %1116 = vrot.lane.b32.xlu1 %v1114_v40, %s2541_s13  ;;  %v627_v32 = vrot.slane %v2713_v13, %v626_v31 }
 0x3e1   :  { %v797_v33 = vadd.f32 %v2715_v14, %v627_v32 }
 0x451   :  { %v1117_v41 = vpop.permute.xlu1 %1116 }
 0x452   :  { %2163 = vmatmul.mubr.msk.f32.vlgmr.msra.gmra.mxu1 %vm1015_vm2, %v1117_v41 }
 0x453   :  { %2166 = vmatpush3.msra.mxu1 %v2668_v43  ;;  %2173 = vmatprep.mubr.msk.f32.mxu1 %vm2555_vm1, %v2554_v0 }
 0x454   :  { %2167 = vmatprep.subr.mxu1 %v2554_v0 }
 0x455   :  { %2168 = vmatpush3.msra.mxu1 %v2672_v46 }
 0x456   :  { %2169 = vmatprep.subr.mxu1 %v2554_v0 }
 0x457   :  { %2170 = vmatpush3.msra.mxu1 %v2676_v49 }
 0x458   :  { %2171 = vmatprep.subr.mxu1 %v2554_v0 }
 0x459   :  { %2172 = vmatpush3.msra.mxu1 %v2680_v29 }
 0x45a   :  { %2176 = vmatprep.subr.mxu1 %v2554_v0 }
 0x512   :  { %v1186_v47 = vpop.f32.mrf.mxu1 }
 0x513   :  { %v1190_v48 = vadd.f32 %v1186_v47, %v726_v45 }
 0x514   :  { %v2164_v50 = vpop.f32.mrf.mxu1 }
 0x515   :  { %v2033_v51 = vmul.f32 -1.442695, %v1190_v48 }
 0x517   :  { %2279 = vpow2.f32 %v2033_v51 }
 0x524   :  { %v2280_v52 = vpop.eup %2279 }
 0x525   :  { %v1194_v53 = vadd.f32 1.0, %v2280_v52 }
 0x527   :  { %2281 = vrcp.f32 %v1194_v53  ;;  %v865_v53 = vpop.f32.mrf.mxu0 }
 0x534   :  { %v2282_v54 = vpop.eup %2281 }
 0x535   :  { %v1197_v55 = vmul.f32 2.0, %v2282_v54  ;;  %v1199_v18 = vmul.f32 %v2282_v54, %v1108_v37 }
 0x537   :  { %v2034_v56 = vadd.f32 -1.0, %v1197_v55  ;;  %v867_v55 = vpop.f32.mrf.mxu0 }
 0x539   :  { %1201 = vrot.lane.b32.xlu0 %v2034_v56, %s2556_s6  ;;  %v2794_v56 = vpop.f32.mrf.mxu0 }
 0x5ab   :  { %v1202_v57 = vpop.permute.xlu0 %1201 }
 0x5ac   :  { %v1204_v58 = vmul.f32 %v2282_v54, %v1202_v57 }
 0x5ae   :  { %1206 = vrot.lane.b32.xlu1 %v1204_v58, %s2556_s6  ;;  %v2797_v58 = vpop.f32.mrf.mxu0 }
 0x620   :  { %v1207_v59 = vpop.permute.xlu1 %1206 }
 0x621   :  { %v1209_v60 = vadd.f32 %v1207_v59, %v1199_v18 }
 0x623   :  { %2283 = vtanh.f32 %v1209_v60 }
 0x630   :  { %v2284_v61 = vpop.eup %2283 }
 0x631   :  { %1212 = vrot.lane.b32.xlu0 %v2284_v61, %s2556_s6 }
 0x6a3   :  { %v1213_v62 = vpop.permute.xlu0 %1212 }
 0x6a4   :  { %v1215_v63 = vmul.f32 %v2282_v54, %v1213_v62  ;;  %v630_v54 = vsub.s32 4, %v2648_v15 }
 0x6a6   :  { %1217 = vrot.lane.b32.xlu1 %v1215_v63, %s2541_s13  ;;  %v631_v57 = vrot.slane %v2713_v13, %v630_v54 }
 0x6a8   :  { %v866_v18 = vadd.f32 %v865_v53, %v631_v57 }
 0x718   :  { %v1218_v1 = vpop.permute.xlu1 %1217 }
 0x719   :  { %2174 = vmatmul.mubr.msk.f32.vlgmr.msra.gmra.mxu1 %vm1015_vm2, %v1218_v1 }
 0x71a   :  { %2177 = vmatpush3.msra.mxu1 %v2668_v43  ;;  %2184 = vmatprep.mubr.msk.f32.mxu1 %vm2555_vm1, %v2554_v0 }
 0x71b   :  { %2178 = vmatprep.subr.mxu1 %v2554_v0 }
 0x71c   :  { %2179 = vmatpush3.msra.mxu1 %v2672_v46 }
 0x71d   :  { %2180 = vmatprep.subr.mxu1 %v2554_v0 }
 0x71e   :  { %2181 = vmatpush3.msra.mxu1 %v2676_v49 }
 0x71f   :  { %2182 = vmatprep.subr.mxu1 %v2554_v0 }
 0x720   :  { %2183 = vmatpush3.msra.mxu1 %v2680_v29 }
 0x721   :  { %2198 = vmatprep.subr.mxu1 %v2554_v0 }
 0x7d9   :  { %v1287_v5 = vpop.f32.mrf.mxu1 }
 0x7da   :  { %v1291_v6 = vadd.f32 %v1287_v5, %v795_v4 }
 0x7db   :  { %v2175_v7 = vpop.f32.mrf.mxu1 }
 0x7dc   :  { %v2036_v8 = vmul.f32 -1.442695, %v1291_v6 }
 0x7de   :  { %2285 = vpow2.f32 %v2036_v8 }
 0x7eb   :  { %v2286_v9 = vpop.eup %2285 }
 0x7ec   :  { %v1295_v10 = vadd.f32 1.0, %v2286_v9 }
 0x7ee   :  { %2287 = vrcp.f32 %v1295_v10 }
 0x7fb   :  { %v2288_v11 = vpop.eup %2287 }
 0x7fc   :  { %v1298_v12 = vmul.f32 2.0, %v2288_v11  ;;  %v1300_v23 = vmul.f32 %v2288_v11, %v1209_v60 }
 0x7fe   :  { %v2037_v19 = vadd.f32 -1.0, %v1298_v12 }
 0x800   :  { %1302 = vrot.lane.b32.xlu0 %v2037_v19, %s2556_s6 }
 0x872   :  { %v1303_v20 = vpop.permute.xlu0 %1302 }
 0x873   :  { %v1305_v22 = vmul.f32 %v2288_v11, %v1303_v20  ;;  %v634_v20 = vsub.s32 5, %v2648_v15 }
 0x875   :  { %1307 = vrot.lane.b32.xlu1 %v1305_v22, %s2556_s6 }
 0x8e7   :  { %v1308_v24 = vpop.permute.xlu1 %1307 }
 0x8e8   :  { %v1310_v30 = vadd.f32 %v1308_v24, %v1300_v23 }
 0x8ea   :  { %2289 = vtanh.f32 %v1310_v30 }
 0x8f7   :  { %v2290_v25 = vpop.eup %2289 }
 0x8f8   :  { %1313 = vrot.lane.b32.xlu0 %v2290_v25, %s2556_s6 }
 0x96a   :  { %v1314_v26 = vpop.permute.xlu0 %1313 }
 0x96b   :  { %v1316_v27 = vmul.f32 %v2288_v11, %v1314_v26 }
 0x96d   :  { %1318 = vrot.lane.b32.xlu1 %v1316_v27, %s2541_s13 }
 0x9df   :  { %v1319_v28 = vpop.permute.xlu1 %1318 }
 0x9e0   :  { %2185 = vmatmul.mubr.msk.f32.vlgmr.msra.gmra.mxu1 %vm1015_vm2, %v1319_v28 }
 0x9e1   :  { %2199 = vmatpush3.msra.mxu1 %v2668_v43  ;;  %2206 = vmatprep.mubr.msk.f32.mxu1 %vm2555_vm1, %v2554_v0 }
 0x9e2   :  { %2200 = vmatprep.subr.mxu1 %v2554_v0 }
 0x9e3   :  { %2201 = vmatpush3.msra.mxu1 %v2672_v46 }
 0x9e4   :  { %2202 = vmatprep.subr.mxu1 %v2554_v0 }
 0x9e5   :  { %2203 = vmatpush3.msra.mxu1 %v2676_v49 }
 0x9e6   :  { %2204 = vmatprep.subr.mxu1 %v2554_v0 }
 0x9e7   :  { %2205 = vmatpush3.msra.mxu1 %v2680_v29 }
 0x9e8   :  { %2220 = vmatprep.subr.mxu1 %v2554_v0 }
 0xaa0   :  { %v1388_v34 = vpop.f32.mrf.mxu1 }
 0xaa1   :  { %v1392_v16 = vadd.f32 %v1388_v34, %v797_v33 }
 0xaa2   :  { %v2186_v35 = vpop.f32.mrf.mxu1 }
 0xaa3   :  { %v2039_v36 = vmul.f32 -1.442695, %v1392_v16 }
 0xaa5   :  { %2291 = vpow2.f32 %v2039_v36 }
 0xab2   :  { %v2292_v37 = vpop.eup %2291 }
 0xab3   :  { %v1396_v38 = vadd.f32 1.0, %v2292_v37 }
 0xab5   :  { %2293 = vrcp.f32 %v1396_v38  ;;  %v638_v38 = vsub.s32 6, %v2648_v15 }
 0xac2   :  { %v2294_v39 = vpop.eup %2293 }
 0xac3   :  { %v1399_v40 = vmul.f32 2.0, %v2294_v39  ;;  %v1401_v45 = vmul.f32 %v2294_v39, %v1310_v30 }
 0xac5   :  { %v2040_v41 = vadd.f32 -1.0, %v1399_v40 }
 0xac7   :  { %1403 = vrot.lane.b32.xlu0 %v2040_v41, %s2556_s6 }
 0xb39   :  { %v1404_v42 = vpop.permute.xlu0 %1403 }
 0xb3a   :  { %v1406_v44 = vmul.f32 %v2294_v39, %v1404_v42 }
 0xb3c   :  { %1408 = vrot.lane.b32.xlu1 %v1406_v44, %s2556_s6 }
 0xbae   :  { %v1409_v47 = vpop.permute.xlu1 %1408 }
 0xbaf   :  { %v1411_v14 = vadd.f32 %v1409_v47, %v1401_v45 }
 0xbb1   :  { %2295 = vtanh.f32 %v1411_v14 }
 0xbbe   :  { %v2296_v48 = vpop.eup %2295 }
 0xbbf   :  { %1414 = vrot.lane.b32.xlu0 %v2296_v48, %s2556_s6 }
 0xc31   :  { %v1415_v50 = vpop.permute.xlu0 %1414 }
 0xc32   :  { %v1417_v51 = vmul.f32 %v2294_v39, %v1415_v50  ;;  %v639_v39 = vrot.slane %v2713_v13, %v638_v38 }
 0xc34   :  { %1419 = vrot.lane.b32.xlu1 %v1417_v51, %s2541_s13  ;;  %v937_v40 = vadd.f32 %v2717_v17, %v639_v39 }
 0xca6   :  { %v1420_v52 = vpop.permute.xlu1 %1419 }
 0xca7   :  { %2196 = vmatmul.mubr.msk.f32.vlgmr.msra.gmra.mxu0 %vm1015_vm2, %v1420_v52 }
 0xca8   :  { %2210 = vmatpush3.msra.mxu0 %v2668_v43  ;;  %2217 = vmatprep.mubr.msk.f32.mxu0 %vm2555_vm1, %v2554_v0 }
 0xca9   :  { %2211 = vmatprep.subr.mxu0 %v2554_v0 }
 0xcaa   :  { %2212 = vmatpush3.msra.mxu0 %v2672_v46 }
 0xcab   :  { %2213 = vmatprep.subr.mxu0 %v2554_v0 }
 0xcac   :  { %2214 = vmatpush3.msra.mxu0 %v2676_v49 }
 0xcad   :  { %2215 = vmatprep.subr.mxu0 %v2554_v0 }
 0xcae   :  { %2216 = vmatpush3.msra.mxu0 %v2680_v29 }
 0xcaf   :  { %2231 = vmatprep.subr.mxu0 %v2554_v0 }
 0xd67   :  { %v1489_v59 = vpop.f32.mrf.mxu0 }
 0xd68   :  { %v1493_v60 = vadd.f32 %v1489_v59, %v866_v18 }
 0xd69   :  { %v2197_v61 = vpop.f32.mrf.mxu0 }
 0xd6a   :  { %v2042_v62 = vmul.f32 -1.442695, %v1493_v60  ;;  %v2092_v61 = vadd.f32 %v2797_v58, %v2794_v56 }
 0xd6c   :  { %2297 = vpow2.f32 %v2042_v62  ;;  %v2029_v62 = vld [vmem:[#allocation10 + $0x8] ss:$0 sm:$0xff] }
 0xd79   :  { %v2298_v63 = vpop.eup %2297 }
 0xd7a   :  { %v1497_v1 = vadd.f32 1.0, %v2298_v63  ;;  %v642_v63 = vsub.s32 7, %v2648_v15 }
 0xd7c   :  { %2299 = vrcp.f32 %v1497_v1  ;;  %v1008_v1 = vadd.f32 %v2092_v61, %v2029_v62 }
 0xd89   :  { %v2300_v2 = vpop.eup %2299 }
 0xd8a   :  { %v1500_v3 = vmul.f32 2.0, %v2300_v2  ;;  %v1502_v7 = vmul.f32 %v2300_v2, %v1411_v14 }
 0xd8c   :  { %v2043_v4 = vadd.f32 -1.0, %v1500_v3  ;;  %v2053_v3 = vmul.f32 -1.442695, %v1008_v1 }
 0xd8e   :  { %1504 = vrot.lane.b32.xlu0 %v2043_v4, %s2556_s6 }
 0xe00   :  { %v1505_v5 = vpop.permute.xlu0 %1504 }
 0xe01   :  { %v1507_v6 = vmul.f32 %v2300_v2, %v1505_v5 }
 0xe03   :  { %1509 = vrot.lane.b32.xlu1 %v1507_v6, %s2556_s6 }
 0xe75   :  { %v1510_v8 = vpop.permute.xlu1 %1509 }
 0xe76   :  { %v1512_v9 = vadd.f32 %v1510_v8, %v1502_v7 }
 0xe78   :  { %2301 = vtanh.f32 %v1512_v9 }
 0xe85   :  { %v2302_v10 = vpop.eup %2301 }
 0xe86   :  { %1515 = vrot.lane.b32.xlu0 %v2302_v10, %s2556_s6 }
 0xef8   :  { %v1516_v11 = vpop.permute.xlu0 %1515 }
 0xef9   :  { %v1518_v12 = vmul.f32 %v2300_v2, %v1516_v11  ;;  %v643_v2 = vrot.slane %v2713_v13, %v642_v63 }
 0xefb   :  { %1520 = vrot.lane.b32.xlu1 %v1518_v12, %s2541_s13  ;;  %v939_v4 = vadd.f32 %v2722_v21, %v643_v2 }
 0xf6d   :  { %v1521_v19 = vpop.permute.xlu1 %1520 }
 0xf6e   :  { %2207 = vmatmul.mubr.msk.f32.vlgmr.msra.gmra.mxu1 %vm1015_vm2, %v1521_v19 }
 0xf6f   :  { %2221 = vmatpush3.msra.mxu1 %v2668_v43  ;;  %2228 = vmatprep.mubr.msk.f32.mxu1 %vm2555_vm1, %v2554_v0  ;;  %v635_v43 = vrot.slane %v2713_v13, %v634_v20 }
 0xf70   :  { %2222 = vmatprep.subr.mxu1 %v2554_v0 }
 0xf71   :  { %2223 = vmatpush3.msra.mxu1 %v2672_v46  ;;  %v868_v22 = vadd.f32 %v867_v55, %v635_v43 }
 0xf72   :  { %2224 = vmatprep.subr.mxu1 %v2554_v0 }
 0xf73   :  { %2225 = vmatpush3.msra.mxu1 %v2676_v49 }
 0xf74   :  { %2226 = vmatprep.subr.mxu1 %v2554_v0 }
 0xf75   :  { %2227 = vmatpush3.msra.mxu1 %v2680_v29 }
 0xf76   :  { %2242 = vmatprep.subr.mxu1 %v2554_v0 }
0x102e   :  { %v1590_v23 = vpop.f32.mrf.mxu1 }
0x102f   :  { %v1594_v24 = vadd.f32 %v1590_v23, %v868_v22 }
0x1030   :  { %v2208_v30 = vpop.f32.mrf.mxu1 }
0x1031   :  { %v2045_v25 = vmul.f32 -1.442695, %v1594_v24  ;;  %v1848_v24 = vld [vmem:[#allocation14 + $0x18] sm:$0xff]  ;;  %v1847_v30 = vld [vmem:[#allocation14 + $0x10] sm:$0xff] }
0x1033   :  { %2303 = vpow2.f32 %v2045_v25 }
0x1040   :  { %v2304_v46 = vpop.eup %2303 }
0x1041   :  { %v1598_v26 = vadd.f32 1.0, %v2304_v46 }
0x1043   :  { %2305 = vrcp.f32 %v1598_v26 }
0x1050   :  { %v2306_v49 = vpop.eup %2305 }
0x1051   :  { %v1601_v27 = vmul.f32 2.0, %v2306_v49  ;;  %v1603_v32 = vmul.f32 %v2306_v49, %v1512_v9 }
0x1053   :  { %v2046_v28 = vadd.f32 -1.0, %v1601_v27  ;;  %v1846_v27 = vld [vmem:[#allocation14 + $0x8] sm:$0xff] }
0x1055   :  { %1605 = vrot.lane.b32.xlu0 %v2046_v28, %s2556_s6  ;;  %v1845_v28 = vld [vmem:[#allocation14] sm:$0xff] }
0x10c7   :  { %v1606_v29 = vpop.permute.xlu0 %1605 }
0x10c8   :  { %v1608_v31 = vmul.f32 %v2306_v49, %v1606_v29  ;;  %v1844_v29 = vld [vmem:[#allocation13 + $0x18] sm:$0xff] }
0x10ca   :  { %1610 = vrot.lane.b32.xlu1 %v1608_v31, %s2556_s6  ;;  %v1843_v31 = vld [vmem:[#allocation13 + $0x10] sm:$0xff] }
0x113c   :  { %v1611_v33 = vpop.permute.xlu1 %1610 }
0x113d   :  { %v1613_v34 = vadd.f32 %v1611_v33, %v1603_v32  ;;  %v1842_v32 = vld [vmem:[#allocation13 + $0x8] sm:$0xff]  ;;  %v1841_v33 = vld [vmem:[#allocation13] sm:$0xff] }
0x113f   :  { %2307 = vtanh.f32 %v1613_v34 }
0x114c   :  { %v2308_v16 = vpop.eup %2307 }
0x114d   :  { %1616 = vrot.lane.b32.xlu0 %v2308_v16, %s2556_s6 }
0x11bf   :  { %v1617_v35 = vpop.permute.xlu0 %1616 }
0x11c0   :  { %v1619_v36 = vmul.f32 %v2306_v49, %v1617_v35 }
0x11c2   :  { %1621 = vrot.lane.b32.xlu1 %v1619_v36, %s2541_s13 }
0x1234   :  { %v1622_v37 = vpop.permute.xlu1 %1621 }
0x1235   :  { %2218 = vmatmul.mubr.msk.f32.vlgmr.msra.gmra.mxu0 %vm1015_vm2, %v1622_v37 }
0x1236   :  { %2239 = vmatprep.mubr.msk.f32.mxu0 %vm2555_vm1, %v2554_v0  ;;  %2232 = vmatpush3.msra.mxu0 %v1848_v24 }
0x1237   :  { %2233 = vmatprep.subr.mxu0 %v2554_v0 }
0x1238   :  { %2234 = vmatpush3.msra.mxu0 %v1847_v30 }
0x1239   :  { %2235 = vmatprep.subr.mxu0 %v2554_v0 }
0x123a   :  { %2236 = vmatpush3.msra.mxu0 %v1846_v27 }
0x123b   :  { %2237 = vmatprep.subr.mxu0 %v2554_v0 }
0x123c   :  { %2238 = vmatpush3.msra.mxu0 %v1845_v28 }
0x12f5   :  { %v1691_v41 = vpop.f32.mrf.mxu0 }
0x12f6   :  { %v1695_v42 = vadd.f32 %v1691_v41, %v937_v40 }
0x12f7   :  { %v2219_v44 = vpop.f32.mrf.mxu0 }
0x12f8   :  { %v2048_v45 = vmul.f32 -1.442695, %v1695_v42  ;;  %v2057_v42 = vld [vmem:[#allocation16] ss:$0 sm:$0xff] }
0x12fa   :  { %2309 = vpow2.f32 %v2048_v45 }
0x1307   :  { %v2310_v47 = vpop.eup %2309 }
0x1308   :  { %v1699_v14 = vadd.f32 1.0, %v2310_v47 }
0x130a   :  { %2311 = vrcp.f32 %v1699_v14 }
0x1317   :  { %v2312_v48 = vpop.eup %2311 }
0x1318   :  { %v1702_v50 = vmul.f32 2.0, %v2312_v48  ;;  %v1704_v54 = vmul.f32 %v2312_v48, %v1613_v34 }
0x131a   :  { %v2049_v51 = vadd.f32 -1.0, %v1702_v50 }
0x131c   :  { %1706 = vrot.lane.b32.xlu0 %v2049_v51, %s2556_s6 }
0x138e   :  { %v1707_v52 = vpop.permute.xlu0 %1706 }
0x138f   :  { %v1709_v53 = vmul.f32 %v2312_v48, %v1707_v52 }
0x1391   :  { %1711 = vrot.lane.b32.xlu1 %v1709_v53, %s2556_s6 }
0x1403   :  { %v1712_v55 = vpop.permute.xlu1 %1711 }
0x1404   :  { %v1714_v17 = vadd.f32 %v1712_v55, %v1704_v54 }
0x1406   :  { %2313 = vtanh.f32 %v1714_v17 }
0x1407   :  { %2315 = vpow2.f32 %v2053_v3 }
0x1413   :  { %v2314_v57 = vpop.eup %2313 }
0x1414   :  { %1717 = vrot.lane.b32.xlu0 %v2314_v57, %s2556_s6  ;;  %v2316_v9 = vpop.eup %2315 }
0x1415   :  { %v1825_v10 = vadd.f32 1.0, %v2316_v9 }
0x1486   :  { %v1718_v18 = vpop.permute.xlu0 %1717 }
0x1487   :  { %v1720_v59 = vmul.f32 %v2312_v48, %v1718_v18 }
0x1489   :  { %1722 = vrot.lane.b32.xlu1 %v1720_v59, %s2541_s13 }
0x14fb   :  { %v1723_v60 = vpop.permute.xlu1 %1722 }
0x14fc   :  { %2229 = vmatmul.mubr.msk.f32.vlgmr.msra.gmra.mxu1 %vm1015_vm2, %v1723_v60 }
0x14fd   :  { %2250 = vmatprep.mubr.msk.f32.mxu1 %vm2555_vm1, %v2554_v0  ;;  %2243 = vmatpush3.msra.mxu1 %v1844_v29 }
0x14fe   :  { %2244 = vmatprep.subr.mxu1 %v2554_v0 }
0x14ff   :  { %2245 = vmatpush3.msra.mxu1 %v1843_v31 }
0x1500   :  { %2246 = vmatprep.subr.mxu1 %v2554_v0 }
0x1501   :  { %2247 = vmatpush3.msra.mxu1 %v1842_v32 }
0x1502   :  { %2248 = vmatprep.subr.mxu1 %v2554_v0 }
0x1503   :  { %2249 = vmatpush3.msra.mxu1 %v1841_v33 }
0x15bc   :  { %v1792_v5 = vpop.f32.mrf.mxu1 }
0x15bd   :  { %v1796_v6 = vadd.f32 %v1792_v5, %v939_v4 }
0x15be   :  { %v2230_v7 = vpop.f32.mrf.mxu1 }
0x15bf   :  { %v2051_v8 = vmul.f32 -1.442695, %v1796_v6 }
0x15c1   :  { %2317 = vpow2.f32 %v2051_v8 }
0x15c2   :  { %2319 = vrcp.f32 %v1825_v10 }
0x15ce   :  { %v2318_v11 = vpop.eup %2317 }
0x15cf   :  { %v1800_v12 = vadd.f32 1.0, %v2318_v11  ;;  %v2320_v56 = vpop.eup %2319 }
0x15d0   :  { %v1828_v13 = vmul.f32 2.0, %v2320_v56 }
0x15d1   :  { %2321 = vrcp.f32 %v1800_v12 }
0x15d2   :  { %v2054_v21 = vadd.f32 -1.0, %v1828_v13 }
0x15de   :  { %v2322_v15 = vpop.eup %2321 }
0x15df   :  { %v1803_v58 = vmul.f32 2.0, %v2322_v15  ;;  %v1805_v46 = vmul.f32 %v2322_v15, %v1714_v17 }
0x15e1   :  { %v2052_v19 = vadd.f32 -1.0, %v1803_v58 }
0x15e3   :  { %1807 = vrot.lane.b32.xlu0 %v2052_v19, %s2556_s6 }
0x15e7   :  { %1831 = vrot.lane.b32.xlu0 %v2054_v21, %s2556_s6 }
0x1655   :  { %v1808_v20 = vpop.permute.xlu0 %1807 }
0x1656   :  { %v1810_v43 = vmul.f32 %v2322_v15, %v1808_v20 }
0x1658   :  { %1812 = vrot.lane.b32.xlu1 %v1810_v43, %s2556_s6 }
0x1659   :  { %v1832_v22 = vpop.permute.xlu0 %1831 }
0x165a   :  { %v1834_v23 = vmul.f32 %v2320_v56, %v1832_v22 }
0x165c   :  { %2323 = vtanh.f32 %v1834_v23 }
0x1669   :  { %v2324_v25 = vpop.eup %2323 }
0x166a   :  { %1837 = vrot.lane.b32.xlu0 %v2324_v25, %s2557_s8 }
0x16ca   :  { %v1813_v26 = vpop.permute.xlu1 %1812 }
0x16cb   :  { %v1815_v49 = vadd.f32 %v1813_v26, %v1805_v46 }
0x16cd   :  { %2325 = vtanh.f32 %v1815_v49 }
0x16da   :  { %v2326_v34 = vpop.eup %2325 }
0x16db   :  { %1818 = vrot.lane.b32.xlu1 %v2326_v34, %s2556_s6 }
0x16dc   :  { %v1838_v16 = vpop.permute.xlu0 %1837 }
0x16dd   :  { %v1840_v35 = vmul.f32 %v2320_v56, %v1838_v16 }
0x16df   :  { %1850 = vrot.lane.b32.xlu1 %v1840_v35, %s2541_s13 }
0x174d   :  { %v1819_v36 = vpop.permute.xlu1 %1818 }
0x174e   :  { %v1821_v37 = vmul.f32 %v2322_v15, %v1819_v36 }
0x1750   :  { %1925 = vrot.lane.b32.xlu0 %v1821_v37, %s2541_s13 }
0x1751   :  { %v1851_v38 = vpop.permute.xlu1 %1850 }
0x1752   :  { %2240 = vmatmul.mubr.msk.f32.vlgmr.msra.gmra.mxu0 %vm1015_vm2, %v1851_v38 }
0x17c2   :  { %v1926_v39 = vpop.permute.xlu0 %1925 }
0x17c3   :  { %2251 = vmatmul.mubr.msk.f32.vlgmr.msra.gmra.mxu1 %vm1015_vm2, %v1926_v39 }
0x1812   :  { %v1920_v40 = vpop.f32.mrf.mxu0 }
0x1814   :  { %v2241_v0 = vpop.f32.mrf.mxu0 }
0x1883   :  { %v1995_v41 = vpop.f32.mrf.mxu1 }
0x1884   :  { %v1996_v44 = vadd.f32 %v1995_v41, %v1920_v40 }
0x1885   :  { %v2252_v45 = vpop.f32.mrf.mxu1 }
0x1886   :  { %v2006_v47 = vadd.f32 %v2057_v42, %v1996_v44 }
0x1888   :  { %2007 = vst [vmem:[#allocation17] sm:$0x3] %v2006_v47 }
0x1889   :  { %2518 = shalt.err (!%p2515_p7)
}
0x188a   :  { %2017 = dma.vmem_to_hbm [thread:$0]  %s2015_s26, 32, %s2864_s9, [#allocation4]  }
0x188b   :  { %2537 = dma.done.wait [#allocation4], 32  }
0x188c   :  { %2538 = vsyncadd [#allocation4], 4294967264 }
0x188d   :  { %2021 = vsyncpa [#allocation3], 1 }
0x188e   :  { %2022 = vsyncpa [#allocation6], 1 }
0x188f   :  { %2023 = vsyncpa [#allocation9], 1 }
0x1890   :  { %2024 = vsyncpa [#allocation12], 1 }
0x1891   :  { %2025 = vsyncpa [#allocation15], 1 }
0x1892   :  { %2026 = vsyncpa [#allocation4], 1 }

</bundles_post_ra>
